<compile_context>
chip_gen: v5e
topology: v5e:2x2
jax: 0.10.0
libtpu: 0.0.40
codegen_flags: <defaults>
</compile_context>

<pallas_src>
import functools

import jax
import jax.numpy as jnp
from jax.experimental import pallas as pl
from jax.experimental.pallas import tpu as pltpu

# ------------------------------- config ------------------------------------
N_NODES  = 16
N_EDGES  = 32
HIDDEN   = 32            # cfg.in_dim == latent_dims == [32, 32]
N_LAYERS = 2
N_HEADS  = 4             # cfg.num_heads == [4, 4]
HEAD_DIM = HIDDEN // N_HEADS
EDGE_DIM = 16            # cfg.edge_dim
POS_DIM  = 4
FFN_DIM  = 2 * HIDDEN
OUT_DIM  = 4 + HIDDEN    # concat(padding_zeros, x)

_VMEM = functools.partial(pl.BlockSpec, memory_space=pltpu.MemorySpace.VMEM)

_PARAM_ORDER = (
    "w_msg", "b_msg", "w_edge",
    "w_local", "b_local",
    "w_qkv", "b_qkv",
    "w_o", "b_o",
    "w1", "b1", "w2", "b2",
    "ln1_g", "ln1_b", "ln2_g", "ln2_b",
    "w_off", "b_off",
)


# ------------------------------ fused kernel --------------------------------
def _layernorm(v, g, b):
    mu = jnp.mean(v, axis=-1, keepdims=True)
    var = jnp.mean((v - mu) ** 2, axis=-1, keepdims=True)
    return (v - mu) * jax.lax.rsqrt(var + 1e-5) * g + b


def _fused_forward_kernel(x_ref, ei_ne_ref, ei_en_ref, ea_ref,
                          w_msg_ref, b_msg_ref, w_edge_ref,
                          w_local_ref, b_local_ref,
                          w_qkv_ref, b_qkv_ref,
                          w_o_ref, b_o_ref,
                          w1_ref, b1_ref, w2_ref, b2_ref,
                          ln1_g_ref, ln1_b_ref, ln2_g_ref, ln2_b_ref,
                          w_off_ref, b_off_ref,
                          o_ref):
    f32 = jnp.float32
    n = x_ref.shape[0]
    e = ea_ref.shape[0]

    x = x_ref[...]                                  # (N, H)
    edge_attr = ea_ref[...]                         # (E, EDGE_DIM)

    # ---- one-hot gather/scatter matrices built from edge_index in-kernel ----
    # messages flow from x_j (= edge_index[1]) into x_i (= edge_index[0])
    src_row = ei_ne_ref[...][0:1, :]                # (1, E) aggregation target x_i
    dst_col = ei_en_ref[...][:, 1:2]                # (E, 1) message source   x_j
    iota_ne = jax.lax.broadcasted_iota(jnp.int32, (n, e), 0)
    iota_en = jax.lax.broadcasted_iota(jnp.int32, (e, n), 1)
    scatter_ne = (iota_ne == src_row).astype(f32)   # (N, E): agg = scatter @ msg
    gather_en = (iota_en == dst_col).astype(f32)    # (E, N): x_j = gather @ x

    scale = 1.0 / (HEAD_DIM ** 0.5)
    padding = jnp.zeros((n, 4), f32)                # padding_zeros accumulator

    for l in range(N_LAYERS):
        # ---- local GINE-style message passing (all on MXU) ----
        x_j = jnp.dot(gather_en, x, preferred_element_type=f32)                  # (E, H)
        msg = jnp.dot(x_j, w_msg_ref[l], preferred_element_type=f32)
        msg = msg + jnp.dot(edge_attr, w_edge_ref[l], preferred_element_type=f32)
        msg = jnp.maximum(msg + b_msg_ref[l], 0.0)
        agg = jnp.dot(scatter_ne, msg, preferred_element_type=f32)               # (N, H)
        local_out = jnp.dot(x + agg, w_local_ref[l], preferred_element_type=f32)
        local_out = jnp.maximum(local_out + b_local_ref[l], 0.0)

        # ---- global dense multi-head self-attention (node-major, fused QKV) ----
        qkv = jnp.dot(x, w_qkv_ref[l], preferred_element_type=f32) + b_qkv_ref[l]
        attn_out = b_o_ref[l] + jnp.zeros((n, HIDDEN), f32)
        w_o_l = w_o_ref[l]
        for h in range(N_HEADS):
            q_h = qkv[:, h * HEAD_DIM:(h + 1) * HEAD_DIM]
            k_h = qkv[:, HIDDEN + h * HEAD_DIM:HIDDEN + (h + 1) * HEAD_DIM]
            v_h = qkv[:, 2 * HIDDEN + h * HEAD_DIM:2 * HIDDEN + (h + 1) * HEAD_DIM]
            s = jax.lax.dot_general(q_h, k_h, (((1,), (1,)), ((), ())),
                                    preferred_element_type=f32) * scale          # (N, N)
            s = s - jnp.max(s, axis=-1, keepdims=True)
            p = jnp.exp(s)
            p = p * pl.reciprocal(jnp.sum(p, axis=-1, keepdims=True), approx=True)
            o_h = jnp.dot(p, v_h, preferred_element_type=f32)                    # (N, Dh)
            # summing per-head out-proj slices == concat(heads) @ W_o
            attn_out = attn_out + jnp.dot(
                o_h, w_o_l[h * HEAD_DIM:(h + 1) * HEAD_DIM, :],
                preferred_element_type=f32)

        # ---- residuals + layernorm + FFN ----
        h1 = _layernorm(x + local_out + attn_out, ln1_g_ref[l], ln1_b_ref[l])
        ffn = jnp.maximum(jnp.dot(h1, w1_ref[l], preferred_element_type=f32)
                          + b1_ref[l], 0.0)
        ffn = jnp.dot(ffn, w2_ref[l], preferred_element_type=f32) + b2_ref[l]
        x = _layernorm(h1 + ffn, ln2_g_ref[l], ln2_b_ref[l])

        # ---- voting head: padding_zeros += offset_head(x) ----
        padding = padding + jnp.dot(x, w_off_ref[...],
                                    preferred_element_type=f32) + b_off_ref[...]

    # ---- out = concat([padding, x], axis=1) as selection matmuls (lane-shift free) ----
    r4 = jax.lax.broadcasted_iota(jnp.int32, (4, OUT_DIM), 0)
    c4 = jax.lax.broadcasted_iota(jnp.int32, (4, OUT_DIM), 1)
    sel_pad = (r4 == c4).astype(f32)                      # [I_4 | 0]
    rh = jax.lax.broadcasted_iota(jnp.int32, (HIDDEN, OUT_DIM), 0)
    ch = jax.lax.broadcasted_iota(jnp.int32, (HIDDEN, OUT_DIM), 1)
    sel_x = ((rh + 4) == ch).astype(f32)                  # [0 | I_H]
    o_ref[...] = (jnp.dot(padding, sel_pad, preferred_element_type=f32)
                  + jnp.dot(x, sel_x, preferred_element_type=f32))


# ------------------------------ parameters ----------------------------------
def init_params(key):
    kit = iter(jax.random.split(key, 32))

    def w(*shape):
        fan_in = shape[-2]
        return jax.random.normal(next(kit), shape, jnp.float32) * (fan_in ** -0.5)

    z = lambda *s: jnp.zeros(s, jnp.float32)
    ones = lambda *s: jnp.ones(s, jnp.float32)
    L = N_LAYERS
    return {
        "w_msg":   w(L, HIDDEN, HIDDEN),     "b_msg":   z(L, 1, HIDDEN),
        "w_edge":  w(L, EDGE_DIM, HIDDEN),
        "w_local": w(L, HIDDEN, HIDDEN),     "b_local": z(L, 1, HIDDEN),
        "w_qkv":   w(L, HIDDEN, 3 * HIDDEN), "b_qkv":   z(L, 1, 3 * HIDDEN),
        "w_o":     w(L, HIDDEN, HIDDEN),     "b_o":     z(L, 1, HIDDEN),
        "w1":      w(L, HIDDEN, FFN_DIM),    "b1":      z(L, 1, FFN_DIM),
        "w2":      w(L, FFN_DIM, HIDDEN),    "b2":      z(L, 1, HIDDEN),
        "ln1_g":   ones(L, 1, HIDDEN),       "ln1_b":   z(L, 1, HIDDEN),
        "ln2_g":   ones(L, 1, HIDDEN),       "ln2_b":   z(L, 1, HIDDEN),
        "w_off":   w(HIDDEN, 4),             "b_off":   z(1, 4),
    }


# ------------------------------ model forward --------------------------------
def forward(params, batch, edge_attr=None, pos_enc=None):
    """Mirrors GPSModel_with_voting.forward (GPSLayer internals approximated)."""
    x, edge_index, node_indices = batch
    del node_indices          # carried for interface parity; unused by layers
    del pos_enc               # TODO(synk): GPSLayer pos_enc usage unknown; unused in approximation
    n = x.shape[0]
    e = edge_index.shape[1]
    if edge_attr is None:
        edge_attr = jnp.zeros((e, EDGE_DIM), jnp.float32)

    ei_ne = edge_index.astype(jnp.int32)      # (2, E)
    ei_en = ei_ne.T                           # (E, 2) — avoids in-kernel int transpose

    args = (x.astype(jnp.float32), ei_ne, ei_en, edge_attr.astype(jnp.float32)) + \
           tuple(params[name] for name in _PARAM_ORDER)

    return pl.pallas_call(
        _fused_forward_kernel,
        out_shape=jax.ShapeDtypeStruct((n, OUT_DIM), jnp.float32),
        in_specs=[_VMEM() for _ in args],
        out_specs=_VMEM(),
    )(*args)


# --------------------------------- main --------------------------------------
if __name__ == "__main__":
    key = jax.random.PRNGKey(0)
    k_param, k_x, k_ea, k_ei, k_pe = jax.random.split(key, 5)

    params = init_params(k_param)
    x = jax.random.normal(k_x, (N_NODES, HIDDEN), jnp.float32)
    edge_index = jax.random.randint(k_ei, (2, N_EDGES), 0, N_NODES, dtype=jnp.int32)
    edge_attr = jax.random.normal(k_ea, (N_EDGES, EDGE_DIM), jnp.float32)
    pos_enc = jax.random.normal(k_pe, (N_NODES, POS_DIM), jnp.float32)
    node_indices = jnp.arange(N_NODES, dtype=jnp.int32)

    out = jax.jit(forward)(params, (x, edge_index, node_indices), edge_attr, pos_enc)
    out = jax.block_until_ready(out)

    assert out.shape == (N_NODES, 4 + HIDDEN), out.shape
    assert bool(jnp.all(jnp.isfinite(out)))
    print("KERNEL_OK")
</pallas_src>

<mosaic_0001>
module attributes {stable_mosaic.version = 11 : i64} {
  func.func @_fused_forward_kernel(%arg0: memref<16x32xf32, #tpu.memory_space<vmem>>, %arg1: memref<2x32xi32, #tpu.memory_space<vmem>>, %arg2: memref<32x2xi32, #tpu.memory_space<vmem>>, %arg3: memref<32x16xf32, #tpu.memory_space<vmem>>, %arg4: memref<2x32x32xf32, #tpu.memory_space<vmem>>, %arg5: memref<2x1x32xf32, #tpu.memory_space<vmem>>, %arg6: memref<2x16x32xf32, #tpu.memory_space<vmem>>, %arg7: memref<2x32x32xf32, #tpu.memory_space<vmem>>, %arg8: memref<2x1x32xf32, #tpu.memory_space<vmem>>, %arg9: memref<2x32x96xf32, #tpu.memory_space<vmem>>, %arg10: memref<2x1x96xf32, #tpu.memory_space<vmem>>, %arg11: memref<2x32x32xf32, #tpu.memory_space<vmem>>, %arg12: memref<2x1x32xf32, #tpu.memory_space<vmem>>, %arg13: memref<2x32x64xf32, #tpu.memory_space<vmem>>, %arg14: memref<2x1x64xf32, #tpu.memory_space<vmem>>, %arg15: memref<2x64x32xf32, #tpu.memory_space<vmem>>, %arg16: memref<2x1x32xf32, #tpu.memory_space<vmem>>, %arg17: memref<2x1x32xf32, #tpu.memory_space<vmem>>, %arg18: memref<2x1x32xf32, #tpu.memory_space<vmem>>, %arg19: memref<2x1x32xf32, #tpu.memory_space<vmem>>, %arg20: memref<2x1x32xf32, #tpu.memory_space<vmem>>, %arg21: memref<32x4xf32, #tpu.memory_space<vmem>>, %arg22: memref<1x4xf32, #tpu.memory_space<vmem>>, %arg23: memref<16x36xf32, #tpu.memory_space<vmem>>) attributes {dimension_semantics = [], scalar_prefetch = 0 : i64, scratch_operands = 0 : i64, tpu.core_type = #tpu.core_type<tc>} {
    %c0 = arith.constant 0 : index
    %c0_0 = arith.constant 0 : index
    %0 = vector.load %arg0[%c0, %c0_0] : memref<16x32xf32, #tpu.memory_space<vmem>>, vector<16x32xf32>
    %c0_1 = arith.constant 0 : index
    %c0_2 = arith.constant 0 : index
    %1 = vector.load %arg3[%c0_1, %c0_2] : memref<32x16xf32, #tpu.memory_space<vmem>>, vector<32x16xf32>
    %c0_3 = arith.constant 0 : index
    %c0_4 = arith.constant 0 : index
    %2 = vector.load %arg1[%c0_3, %c0_4] : memref<2x32xi32, #tpu.memory_space<vmem>>, vector<2x32xi32>
    %3 = vector.extract_strided_slice %2 {offsets = [0, 0], sizes = [1, 32], strides = [1, 1]} : vector<2x32xi32> to vector<1x32xi32>
    %c0_5 = arith.constant 0 : index
    %c0_6 = arith.constant 0 : index
    %4 = vector.load %arg2[%c0_5, %c0_6] : memref<32x2xi32, #tpu.memory_space<vmem>>, vector<32x2xi32>
    %5 = vector.extract_strided_slice %4 {offsets = [0, 1], sizes = [32, 1], strides = [1, 1]} : vector<32x2xi32> to vector<32x1xi32>
    %6 = tpu.iota {dimensions = array<i32: 0>} : vector<16x32xi32>
    %7 = tpu.iota {dimensions = array<i32: 1>} : vector<32x16xi32>
    %8 = vector.broadcast %3 : vector<1x32xi32> to vector<16x32xi32>
    %9 = arith.cmpi eq, %6, %8 : vector<16x32xi32>
    %10 = arith.extui %9 : vector<16x32xi1> to vector<16x32xi32>
    %11 = arith.sitofp %10 : vector<16x32xi32> to vector<16x32xf32>
    %12 = vector.broadcast %5 : vector<32x1xi32> to vector<32x16xi32>
    %13 = arith.cmpi eq, %7, %12 : vector<32x16xi32>
    %14 = arith.extui %13 : vector<32x16xi1> to vector<32x16xi32>
    %15 = arith.sitofp %14 : vector<32x16xi32> to vector<32x16xf32>
    %cst = arith.constant 0.000000e+00 : f32
    %16 = vector.broadcast %cst : f32 to vector<16x4xf32>
    %cst_7 = arith.constant dense<0.000000e+00> : vector<32x32xf32>
    %17 = tpu.matmul %15, %0, %cst_7 {dimension_numbers = #tpu.dot_dimension_numbers<[1], [0], [0], [1], [0, 0, 1, 1], [], []>} : vector<32x16xf32>, vector<16x32xf32>, vector<32x32xf32> -> vector<32x32xf32>
    %c0_8 = arith.constant 0 : index
    %c0_9 = arith.constant 0 : index
    %c0_10 = arith.constant 0 : index
    %18 = vector.load %arg4[%c0_8, %c0_9, %c0_10] : memref<2x32x32xf32, #tpu.memory_space<vmem>>, vector<1x32x32xf32>
    %19 = vector.shape_cast %18 : vector<1x32x32xf32> to vector<32x32xf32>
    %cst_11 = arith.constant dense<0.000000e+00> : vector<32x32xf32>
    %20 = tpu.matmul %17, %19, %cst_11 {dimension_numbers = #tpu.dot_dimension_numbers<[1], [0], [0], [1], [0, 0, 1, 1], [], []>} : vector<32x32xf32>, vector<32x32xf32>, vector<32x32xf32> -> vector<32x32xf32>
    %c0_12 = arith.constant 0 : index
    %c0_13 = arith.constant 0 : index
    %c0_14 = arith.constant 0 : index
    %21 = vector.load %arg6[%c0_12, %c0_13, %c0_14] : memref<2x16x32xf32, #tpu.memory_space<vmem>>, vector<1x16x32xf32>
    %22 = vector.shape_cast %21 : vector<1x16x32xf32> to vector<16x32xf32>
    %cst_15 = arith.constant dense<0.000000e+00> : vector<32x32xf32>
    %23 = tpu.matmul %1, %22, %cst_15 {dimension_numbers = #tpu.dot_dimension_numbers<[1], [0], [0], [1], [0, 0, 1, 1], [], []>} : vector<32x16xf32>, vector<16x32xf32>, vector<32x32xf32> -> vector<32x32xf32>
    %24 = arith.addf %20, %23 : vector<32x32xf32>
    %c0_16 = arith.constant 0 : index
    %c0_17 = arith.constant 0 : index
    %c0_18 = arith.constant 0 : index
    %25 = vector.load %arg5[%c0_16, %c0_17, %c0_18] : memref<2x1x32xf32, #tpu.memory_space<vmem>>, vector<1x1x32xf32>
    %26 = vector.shape_cast %25 : vector<1x1x32xf32> to vector<1x32xf32>
    %27 = vector.broadcast %26 : vector<1x32xf32> to vector<32x32xf32>
    %28 = arith.addf %24, %27 : vector<32x32xf32>
    %cst_19 = arith.constant 0.000000e+00 : f32
    %29 = vector.broadcast %cst_19 : f32 to vector<32x32xf32>
    %30 = arith.maximumf %28, %29 : vector<32x32xf32>
    %cst_20 = arith.constant dense<0.000000e+00> : vector<16x32xf32>
    %31 = tpu.matmul %11, %30, %cst_20 {dimension_numbers = #tpu.dot_dimension_numbers<[1], [0], [0], [1], [0, 0, 1, 1], [], []>} : vector<16x32xf32>, vector<32x32xf32>, vector<16x32xf32> -> vector<16x32xf32>
    %32 = arith.addf %0, %31 : vector<16x32xf32>
    %c0_21 = arith.constant 0 : index
    %c0_22 = arith.constant 0 : index
    %c0_23 = arith.constant 0 : index
    %33 = vector.load %arg7[%c0_21, %c0_22, %c0_23] : memref<2x32x32xf32, #tpu.memory_space<vmem>>, vector<1x32x32xf32>
    %34 = vector.shape_cast %33 : vector<1x32x32xf32> to vector<32x32xf32>
    %cst_24 = arith.constant dense<0.000000e+00> : vector<16x32xf32>
    %35 = tpu.matmul %32, %34, %cst_24 {dimension_numbers = #tpu.dot_dimension_numbers<[1], [0], [0], [1], [0, 0, 1, 1], [], []>} : vector<16x32xf32>, vector<32x32xf32>, vector<16x32xf32> -> vector<16x32xf32>
    %c0_25 = arith.constant 0 : index
    %c0_26 = arith.constant 0 : index
    %c0_27 = arith.constant 0 : index
    %36 = vector.load %arg8[%c0_25, %c0_26, %c0_27] : memref<2x1x32xf32, #tpu.memory_space<vmem>>, vector<1x1x32xf32>
    %37 = vector.shape_cast %36 : vector<1x1x32xf32> to vector<1x32xf32>
    %38 = vector.broadcast %37 : vector<1x32xf32> to vector<16x32xf32>
    %39 = arith.addf %35, %38 : vector<16x32xf32>
    %cst_28 = arith.constant 0.000000e+00 : f32
    %40 = vector.broadcast %cst_28 : f32 to vector<16x32xf32>
    %41 = arith.maximumf %39, %40 : vector<16x32xf32>
    %c0_29 = arith.constant 0 : index
    %c0_30 = arith.constant 0 : index
    %c0_31 = arith.constant 0 : index
    %42 = vector.load %arg9[%c0_29, %c0_30, %c0_31] : memref<2x32x96xf32, #tpu.memory_space<vmem>>, vector<1x32x96xf32>
    %43 = vector.shape_cast %42 : vector<1x32x96xf32> to vector<32x96xf32>
    %cst_32 = arith.constant dense<0.000000e+00> : vector<16x96xf32>
    %44 = tpu.matmul %0, %43, %cst_32 {dimension_numbers = #tpu.dot_dimension_numbers<[1], [0], [0], [1], [0, 0, 1, 1], [], []>} : vector<16x32xf32>, vector<32x96xf32>, vector<16x96xf32> -> vector<16x96xf32>
    %c0_33 = arith.constant 0 : index
    %c0_34 = arith.constant 0 : index
    %c0_35 = arith.constant 0 : index
    %45 = vector.load %arg10[%c0_33, %c0_34, %c0_35] : memref<2x1x96xf32, #tpu.memory_space<vmem>>, vector<1x1x96xf32>
    %46 = vector.shape_cast %45 : vector<1x1x96xf32> to vector<1x96xf32>
    %47 = vector.broadcast %46 : vector<1x96xf32> to vector<16x96xf32>
    %48 = arith.addf %44, %47 : vector<16x96xf32>
    %c0_36 = arith.constant 0 : index
    %c0_37 = arith.constant 0 : index
    %c0_38 = arith.constant 0 : index
    %49 = vector.load %arg12[%c0_36, %c0_37, %c0_38] : memref<2x1x32xf32, #tpu.memory_space<vmem>>, vector<1x1x32xf32>
    %50 = vector.shape_cast %49 : vector<1x1x32xf32> to vector<1x32xf32>
    %cst_39 = arith.constant 0.000000e+00 : f32
    %51 = vector.broadcast %cst_39 : f32 to vector<16x32xf32>
    %52 = vector.broadcast %50 : vector<1x32xf32> to vector<16x32xf32>
    %53 = arith.addf %52, %51 : vector<16x32xf32>
    %c0_40 = arith.constant 0 : index
    %c0_41 = arith.constant 0 : index
    %c0_42 = arith.constant 0 : index
    %54 = vector.load %arg11[%c0_40, %c0_41, %c0_42] : memref<2x32x32xf32, #tpu.memory_space<vmem>>, vector<1x32x32xf32>
    %55 = vector.shape_cast %54 : vector<1x32x32xf32> to vector<32x32xf32>
    %56 = vector.extract_strided_slice %48 {offsets = [0, 0], sizes = [16, 8], strides = [1, 1]} : vector<16x96xf32> to vector<16x8xf32>
    %57 = vector.extract_strided_slice %48 {offsets = [0, 32], sizes = [16, 8], strides = [1, 1]} : vector<16x96xf32> to vector<16x8xf32>
    %58 = vector.extract_strided_slice %48 {offsets = [0, 64], sizes = [16, 8], strides = [1, 1]} : vector<16x96xf32> to vector<16x8xf32>
    %cst_43 = arith.constant dense<0.000000e+00> : vector<16x16xf32>
    %59 = tpu.matmul %56, %57, %cst_43 {dimension_numbers = #tpu.dot_dimension_numbers<[1], [1], [0], [0], [0, 0, 1, 0], [], []>} : vector<16x8xf32>, vector<16x8xf32>, vector<16x16xf32> -> vector<16x16xf32>
    %cst_44 = arith.constant 0.353553385 : f32
    %60 = vector.broadcast %cst_44 : f32 to vector<16x16xf32>
    %61 = arith.mulf %59, %60 : vector<16x16xf32>
    %cst_45 = arith.constant dense<0xFF800000> : vector<16xf32>
    %62 = vector.multi_reduction <maximumf>, %61, %cst_45 [1] : vector<16x16xf32> to vector<16xf32>
    %63 = vector.shape_cast %62 : vector<16xf32> to vector<16x1xf32>
    %64 = vector.broadcast %63 : vector<16x1xf32> to vector<16x16xf32>
    %65 = arith.subf %61, %64 : vector<16x16xf32>
    %66 = math.exp %65 : vector<16x16xf32>
    %cst_46 = arith.constant dense<0.000000e+00> : vector<16xf32>
    %67 = vector.multi_reduction <add>, %66, %cst_46 [1] : vector<16x16xf32> to vector<16xf32>
    %68 = vector.shape_cast %67 : vector<16xf32> to vector<16x1xf32>
    %69 = tpu.reciprocal %68 {approx = true} : vector<16x1xf32> -> vector<16x1xf32>
    %70 = vector.broadcast %69 : vector<16x1xf32> to vector<16x16xf32>
    %71 = arith.mulf %66, %70 : vector<16x16xf32>
    %cst_47 = arith.constant dense<0.000000e+00> : vector<16x8xf32>
    %72 = tpu.matmul %71, %58, %cst_47 {dimension_numbers = #tpu.dot_dimension_numbers<[1], [0], [0], [1], [0, 0, 1, 1], [], []>} : vector<16x16xf32>, vector<16x8xf32>, vector<16x8xf32> -> vector<16x8xf32>
    %73 = vector.extract_strided_slice %55 {offsets = [0, 0], sizes = [8, 32], strides = [1, 1]} : vector<32x32xf32> to vector<8x32xf32>
    %cst_48 = arith.constant dense<0.000000e+00> : vector<16x32xf32>
    %74 = tpu.matmul %72, %73, %cst_48 {dimension_numbers = #tpu.dot_dimension_numbers<[1], [0], [0], [1], [0, 0, 1, 1], [], []>} : vector<16x8xf32>, vector<8x32xf32>, vector<16x32xf32> -> vector<16x32xf32>
    %75 = arith.addf %53, %74 : vector<16x32xf32>
    %76 = vector.extract_strided_slice %48 {offsets = [0, 8], sizes = [16, 8], strides = [1, 1]} : vector<16x96xf32> to vector<16x8xf32>
    %77 = vector.extract_strided_slice %48 {offsets = [0, 40], sizes = [16, 8], strides = [1, 1]} : vector<16x96xf32> to vector<16x8xf32>
    %78 = vector.extract_strided_slice %48 {offsets = [0, 72], sizes = [16, 8], strides = [1, 1]} : vector<16x96xf32> to vector<16x8xf32>
    %cst_49 = arith.constant dense<0.000000e+00> : vector<16x16xf32>
    %79 = tpu.matmul %76, %77, %cst_49 {dimension_numbers = #tpu.dot_dimension_numbers<[1], [1], [0], [0], [0, 0, 1, 0], [], []>} : vector<16x8xf32>, vector<16x8xf32>, vector<16x16xf32> -> vector<16x16xf32>
    %cst_50 = arith.constant 0.353553385 : f32
    %80 = vector.broadcast %cst_50 : f32 to vector<16x16xf32>
    %81 = arith.mulf %79, %80 : vector<16x16xf32>
    %cst_51 = arith.constant dense<0xFF800000> : vector<16xf32>
    %82 = vector.multi_reduction <maximumf>, %81, %cst_51 [1] : vector<16x16xf32> to vector<16xf32>
    %83 = vector.shape_cast %82 : vector<16xf32> to vector<16x1xf32>
    %84 = vector.broadcast %83 : vector<16x1xf32> to vector<16x16xf32>
    %85 = arith.subf %81, %84 : vector<16x16xf32>
    %86 = math.exp %85 : vector<16x16xf32>
    %cst_52 = arith.constant dense<0.000000e+00> : vector<16xf32>
    %87 = vector.multi_reduction <add>, %86, %cst_52 [1] : vector<16x16xf32> to vector<16xf32>
    %88 = vector.shape_cast %87 : vector<16xf32> to vector<16x1xf32>
    %89 = tpu.reciprocal %88 {approx = true} : vector<16x1xf32> -> vector<16x1xf32>
    %90 = vector.broadcast %89 : vector<16x1xf32> to vector<16x16xf32>
    %91 = arith.mulf %86, %90 : vector<16x16xf32>
    %cst_53 = arith.constant dense<0.000000e+00> : vector<16x8xf32>
    %92 = tpu.matmul %91, %78, %cst_53 {dimension_numbers = #tpu.dot_dimension_numbers<[1], [0], [0], [1], [0, 0, 1, 1], [], []>} : vector<16x16xf32>, vector<16x8xf32>, vector<16x8xf32> -> vector<16x8xf32>
    %93 = vector.extract_strided_slice %55 {offsets = [8, 0], sizes = [8, 32], strides = [1, 1]} : vector<32x32xf32> to vector<8x32xf32>
    %cst_54 = arith.constant dense<0.000000e+00> : vector<16x32xf32>
    %94 = tpu.matmul %92, %93, %cst_54 {dimension_numbers = #tpu.dot_dimension_numbers<[1], [0], [0], [1], [0, 0, 1, 1], [], []>} : vector<16x8xf32>, vector<8x32xf32>, vector<16x32xf32> -> vector<16x32xf32>
    %95 = arith.addf %75, %94 : vector<16x32xf32>
    %96 = vector.extract_strided_slice %48 {offsets = [0, 16], sizes = [16, 8], strides = [1, 1]} : vector<16x96xf32> to vector<16x8xf32>
    %97 = vector.extract_strided_slice %48 {offsets = [0, 48], sizes = [16, 8], strides = [1, 1]} : vector<16x96xf32> to vector<16x8xf32>
    %98 = vector.extract_strided_slice %48 {offsets = [0, 80], sizes = [16, 8], strides = [1, 1]} : vector<16x96xf32> to vector<16x8xf32>
    %cst_55 = arith.constant dense<0.000000e+00> : vector<16x16xf32>
    %99 = tpu.matmul %96, %97, %cst_55 {dimension_numbers = #tpu.dot_dimension_numbers<[1], [1], [0], [0], [0, 0, 1, 0], [], []>} : vector<16x8xf32>, vector<16x8xf32>, vector<16x16xf32> -> vector<16x16xf32>
    %cst_56 = arith.constant 0.353553385 : f32
    %100 = vector.broadcast %cst_56 : f32 to vector<16x16xf32>
    %101 = arith.mulf %99, %100 : vector<16x16xf32>
    %cst_57 = arith.constant dense<0xFF800000> : vector<16xf32>
    %102 = vector.multi_reduction <maximumf>, %101, %cst_57 [1] : vector<16x16xf32> to vector<16xf32>
    %103 = vector.shape_cast %102 : vector<16xf32> to vector<16x1xf32>
    %104 = vector.broadcast %103 : vector<16x1xf32> to vector<16x16xf32>
    %105 = arith.subf %101, %104 : vector<16x16xf32>
    %106 = math.exp %105 : vector<16x16xf32>
    %cst_58 = arith.constant dense<0.000000e+00> : vector<16xf32>
    %107 = vector.multi_reduction <add>, %106, %cst_58 [1] : vector<16x16xf32> to vector<16xf32>
    %108 = vector.shape_cast %107 : vector<16xf32> to vector<16x1xf32>
    %109 = tpu.reciprocal %108 {approx = true} : vector<16x1xf32> -> vector<16x1xf32>
    %110 = vector.broadcast %109 : vector<16x1xf32> to vector<16x16xf32>
    %111 = arith.mulf %106, %110 : vector<16x16xf32>
    %cst_59 = arith.constant dense<0.000000e+00> : vector<16x8xf32>
    %112 = tpu.matmul %111, %98, %cst_59 {dimension_numbers = #tpu.dot_dimension_numbers<[1], [0], [0], [1], [0, 0, 1, 1], [], []>} : vector<16x16xf32>, vector<16x8xf32>, vector<16x8xf32> -> vector<16x8xf32>
    %113 = vector.extract_strided_slice %55 {offsets = [16, 0], sizes = [8, 32], strides = [1, 1]} : vector<32x32xf32> to vector<8x32xf32>
    %cst_60 = arith.constant dense<0.000000e+00> : vector<16x32xf32>
    %114 = tpu.matmul %112, %113, %cst_60 {dimension_numbers = #tpu.dot_dimension_numbers<[1], [0], [0], [1], [0, 0, 1, 1], [], []>} : vector<16x8xf32>, vector<8x32xf32>, vector<16x32xf32> -> vector<16x32xf32>
    %115 = arith.addf %95, %114 : vector<16x32xf32>
    %116 = vector.extract_strided_slice %48 {offsets = [0, 24], sizes = [16, 8], strides = [1, 1]} : vector<16x96xf32> to vector<16x8xf32>
    %117 = vector.extract_strided_slice %48 {offsets = [0, 56], sizes = [16, 8], strides = [1, 1]} : vector<16x96xf32> to vector<16x8xf32>
    %118 = vector.extract_strided_slice %48 {offsets = [0, 88], sizes = [16, 8], strides = [1, 1]} : vector<16x96xf32> to vector<16x8xf32>
    %cst_61 = arith.constant dense<0.000000e+00> : vector<16x16xf32>
    %119 = tpu.matmul %116, %117, %cst_61 {dimension_numbers = #tpu.dot_dimension_numbers<[1], [1], [0], [0], [0, 0, 1, 0], [], []>} : vector<16x8xf32>, vector<16x8xf32>, vector<16x16xf32> -> vector<16x16xf32>
    %cst_62 = arith.constant 0.353553385 : f32
    %120 = vector.broadcast %cst_62 : f32 to vector<16x16xf32>
    %121 = arith.mulf %119, %120 : vector<16x16xf32>
    %cst_63 = arith.constant dense<0xFF800000> : vector<16xf32>
    %122 = vector.multi_reduction <maximumf>, %121, %cst_63 [1] : vector<16x16xf32> to vector<16xf32>
    %123 = vector.shape_cast %122 : vector<16xf32> to vector<16x1xf32>
    %124 = vector.broadcast %123 : vector<16x1xf32> to vector<16x16xf32>
    %125 = arith.subf %121, %124 : vector<16x16xf32>
    %126 = math.exp %125 : vector<16x16xf32>
    %cst_64 = arith.constant dense<0.000000e+00> : vector<16xf32>
    %127 = vector.multi_reduction <add>, %126, %cst_64 [1] : vector<16x16xf32> to vector<16xf32>
    %128 = vector.shape_cast %127 : vector<16xf32> to vector<16x1xf32>
    %129 = tpu.reciprocal %128 {approx = true} : vector<16x1xf32> -> vector<16x1xf32>
    %130 = vector.broadcast %129 : vector<16x1xf32> to vector<16x16xf32>
    %131 = arith.mulf %126, %130 : vector<16x16xf32>
    %cst_65 = arith.constant dense<0.000000e+00> : vector<16x8xf32>
    %132 = tpu.matmul %131, %118, %cst_65 {dimension_numbers = #tpu.dot_dimension_numbers<[1], [0], [0], [1], [0, 0, 1, 1], [], []>} : vector<16x16xf32>, vector<16x8xf32>, vector<16x8xf32> -> vector<16x8xf32>
    %133 = vector.extract_strided_slice %55 {offsets = [24, 0], sizes = [8, 32], strides = [1, 1]} : vector<32x32xf32> to vector<8x32xf32>
    %cst_66 = arith.constant dense<0.000000e+00> : vector<16x32xf32>
    %134 = tpu.matmul %132, %133, %cst_66 {dimension_numbers = #tpu.dot_dimension_numbers<[1], [0], [0], [1], [0, 0, 1, 1], [], []>} : vector<16x8xf32>, vector<8x32xf32>, vector<16x32xf32> -> vector<16x32xf32>
    %135 = arith.addf %115, %134 : vector<16x32xf32>
    %136 = arith.addf %0, %41 : vector<16x32xf32>
    %137 = arith.addf %136, %135 : vector<16x32xf32>
    %c0_67 = arith.constant 0 : index
    %c0_68 = arith.constant 0 : index
    %c0_69 = arith.constant 0 : index
    %138 = vector.load %arg17[%c0_67, %c0_68, %c0_69] : memref<2x1x32xf32, #tpu.memory_space<vmem>>, vector<1x1x32xf32>
    %139 = vector.shape_cast %138 : vector<1x1x32xf32> to vector<1x32xf32>
    %c0_70 = arith.constant 0 : index
    %c0_71 = arith.constant 0 : index
    %c0_72 = arith.constant 0 : index
    %140 = vector.load %arg18[%c0_70, %c0_71, %c0_72] : memref<2x1x32xf32, #tpu.memory_space<vmem>>, vector<1x1x32xf32>
    %141 = vector.shape_cast %140 : vector<1x1x32xf32> to vector<1x32xf32>
    %cst_73 = arith.constant dense<0.000000e+00> : vector<16xf32>
    %142 = vector.multi_reduction <add>, %137, %cst_73 [1] : vector<16x32xf32> to vector<16xf32>
    %143 = vector.shape_cast %142 : vector<16xf32> to vector<16x1xf32>
    %cst_74 = arith.constant 3.200000e+01 : f32
    %144 = vector.broadcast %cst_74 : f32 to vector<16x1xf32>
    %145 = arith.divf %143, %144 : vector<16x1xf32>
    %146 = vector.broadcast %145 : vector<16x1xf32> to vector<16x32xf32>
    %147 = arith.subf %137, %146 : vector<16x32xf32>
    %148 = arith.mulf %147, %147 : vector<16x32xf32>
    %cst_75 = arith.constant dense<0.000000e+00> : vector<16xf32>
    %149 = vector.multi_reduction <add>, %148, %cst_75 [1] : vector<16x32xf32> to vector<16xf32>
    %150 = vector.shape_cast %149 : vector<16xf32> to vector<16x1xf32>
    %cst_76 = arith.constant 3.200000e+01 : f32
    %151 = vector.broadcast %cst_76 : f32 to vector<16x1xf32>
    %152 = arith.divf %150, %151 : vector<16x1xf32>
    %153 = vector.broadcast %145 : vector<16x1xf32> to vector<16x32xf32>
    %154 = arith.subf %137, %153 : vector<16x32xf32>
    %cst_77 = arith.constant 9.99999974E-6 : f32
    %155 = vector.broadcast %cst_77 : f32 to vector<16x1xf32>
    %156 = arith.addf %152, %155 : vector<16x1xf32>
    %157 = math.rsqrt %156 : vector<16x1xf32>
    %158 = vector.broadcast %157 : vector<16x1xf32> to vector<16x32xf32>
    %159 = arith.mulf %154, %158 : vector<16x32xf32>
    %160 = vector.broadcast %139 : vector<1x32xf32> to vector<16x32xf32>
    %161 = arith.mulf %159, %160 : vector<16x32xf32>
    %162 = vector.broadcast %141 : vector<1x32xf32> to vector<16x32xf32>
    %163 = arith.addf %161, %162 : vector<16x32xf32>
    %c0_78 = arith.constant 0 : index
    %c0_79 = arith.constant 0 : index
    %c0_80 = arith.constant 0 : index
    %164 = vector.load %arg13[%c0_78, %c0_79, %c0_80] : memref<2x32x64xf32, #tpu.memory_space<vmem>>, vector<1x32x64xf32>
    %165 = vector.shape_cast %164 : vector<1x32x64xf32> to vector<32x64xf32>
    %cst_81 = arith.constant dense<0.000000e+00> : vector<16x64xf32>
    %166 = tpu.matmul %163, %165, %cst_81 {dimension_numbers = #tpu.dot_dimension_numbers<[1], [0], [0], [1], [0, 0, 1, 1], [], []>} : vector<16x32xf32>, vector<32x64xf32>, vector<16x64xf32> -> vector<16x64xf32>
    %c0_82 = arith.constant 0 : index
    %c0_83 = arith.constant 0 : index
    %c0_84 = arith.constant 0 : index
    %167 = vector.load %arg14[%c0_82, %c0_83, %c0_84] : memref<2x1x64xf32, #tpu.memory_space<vmem>>, vector<1x1x64xf32>
    %168 = vector.shape_cast %167 : vector<1x1x64xf32> to vector<1x64xf32>
    %169 = vector.broadcast %168 : vector<1x64xf32> to vector<16x64xf32>
    %170 = arith.addf %166, %169 : vector<16x64xf32>
    %cst_85 = arith.constant 0.000000e+00 : f32
    %171 = vector.broadcast %cst_85 : f32 to vector<16x64xf32>
    %172 = arith.maximumf %170, %171 : vector<16x64xf32>
    %c0_86 = arith.constant 0 : index
    %c0_87 = arith.constant 0 : index
    %c0_88 = arith.constant 0 : index
    %173 = vector.load %arg15[%c0_86, %c0_87, %c0_88] : memref<2x64x32xf32, #tpu.memory_space<vmem>>, vector<1x64x32xf32>
    %174 = vector.shape_cast %173 : vector<1x64x32xf32> to vector<64x32xf32>
    %cst_89 = arith.constant dense<0.000000e+00> : vector<16x32xf32>
    %175 = tpu.matmul %172, %174, %cst_89 {dimension_numbers = #tpu.dot_dimension_numbers<[1], [0], [0], [1], [0, 0, 1, 1], [], []>} : vector<16x64xf32>, vector<64x32xf32>, vector<16x32xf32> -> vector<16x32xf32>
    %c0_90 = arith.constant 0 : index
    %c0_91 = arith.constant 0 : index
    %c0_92 = arith.constant 0 : index
    %176 = vector.load %arg16[%c0_90, %c0_91, %c0_92] : memref<2x1x32xf32, #tpu.memory_space<vmem>>, vector<1x1x32xf32>
    %177 = vector.shape_cast %176 : vector<1x1x32xf32> to vector<1x32xf32>
    %178 = vector.broadcast %177 : vector<1x32xf32> to vector<16x32xf32>
    %179 = arith.addf %175, %178 : vector<16x32xf32>
    %180 = arith.addf %163, %179 : vector<16x32xf32>
    %c0_93 = arith.constant 0 : index
    %c0_94 = arith.constant 0 : index
    %c0_95 = arith.constant 0 : index
    %181 = vector.load %arg19[%c0_93, %c0_94, %c0_95] : memref<2x1x32xf32, #tpu.memory_space<vmem>>, vector<1x1x32xf32>
    %182 = vector.shape_cast %181 : vector<1x1x32xf32> to vector<1x32xf32>
    %c0_96 = arith.constant 0 : index
    %c0_97 = arith.constant 0 : index
    %c0_98 = arith.constant 0 : index
    %183 = vector.load %arg20[%c0_96, %c0_97, %c0_98] : memref<2x1x32xf32, #tpu.memory_space<vmem>>, vector<1x1x32xf32>
    %184 = vector.shape_cast %183 : vector<1x1x32xf32> to vector<1x32xf32>
    %cst_99 = arith.constant dense<0.000000e+00> : vector<16xf32>
    %185 = vector.multi_reduction <add>, %180, %cst_99 [1] : vector<16x32xf32> to vector<16xf32>
    %186 = vector.shape_cast %185 : vector<16xf32> to vector<16x1xf32>
    %cst_100 = arith.constant 3.200000e+01 : f32
    %187 = vector.broadcast %cst_100 : f32 to vector<16x1xf32>
    %188 = arith.divf %186, %187 : vector<16x1xf32>
    %189 = vector.broadcast %188 : vector<16x1xf32> to vector<16x32xf32>
    %190 = arith.subf %180, %189 : vector<16x32xf32>
    %191 = arith.mulf %190, %190 : vector<16x32xf32>
    %cst_101 = arith.constant dense<0.000000e+00> : vector<16xf32>
    %192 = vector.multi_reduction <add>, %191, %cst_101 [1] : vector<16x32xf32> to vector<16xf32>
    %193 = vector.shape_cast %192 : vector<16xf32> to vector<16x1xf32>
    %cst_102 = arith.constant 3.200000e+01 : f32
    %194 = vector.broadcast %cst_102 : f32 to vector<16x1xf32>
    %195 = arith.divf %193, %194 : vector<16x1xf32>
    %196 = vector.broadcast %188 : vector<16x1xf32> to vector<16x32xf32>
    %197 = arith.subf %180, %196 : vector<16x32xf32>
    %cst_103 = arith.constant 9.99999974E-6 : f32
    %198 = vector.broadcast %cst_103 : f32 to vector<16x1xf32>
    %199 = arith.addf %195, %198 : vector<16x1xf32>
    %200 = math.rsqrt %199 : vector<16x1xf32>
    %201 = vector.broadcast %200 : vector<16x1xf32> to vector<16x32xf32>
    %202 = arith.mulf %197, %201 : vector<16x32xf32>
    %203 = vector.broadcast %182 : vector<1x32xf32> to vector<16x32xf32>
    %204 = arith.mulf %202, %203 : vector<16x32xf32>
    %205 = vector.broadcast %184 : vector<1x32xf32> to vector<16x32xf32>
    %206 = arith.addf %204, %205 : vector<16x32xf32>
    %c0_104 = arith.constant 0 : index
    %c0_105 = arith.constant 0 : index
    %207 = vector.load %arg21[%c0_104, %c0_105] : memref<32x4xf32, #tpu.memory_space<vmem>>, vector<32x4xf32>
    %cst_106 = arith.constant dense<0.000000e+00> : vector<16x4xf32>
    %208 = tpu.matmul %206, %207, %cst_106 {dimension_numbers = #tpu.dot_dimension_numbers<[1], [0], [0], [1], [0, 0, 1, 1], [], []>} : vector<16x32xf32>, vector<32x4xf32>, vector<16x4xf32> -> vector<16x4xf32>
    %209 = arith.addf %16, %208 : vector<16x4xf32>
    %c0_107 = arith.constant 0 : index
    %c0_108 = arith.constant 0 : index
    %210 = vector.load %arg22[%c0_107, %c0_108] : memref<1x4xf32, #tpu.memory_space<vmem>>, vector<1x4xf32>
    %211 = vector.broadcast %210 : vector<1x4xf32> to vector<16x4xf32>
    %212 = arith.addf %209, %211 : vector<16x4xf32>
    %cst_109 = arith.constant dense<0.000000e+00> : vector<32x32xf32>
    %213 = tpu.matmul %15, %206, %cst_109 {dimension_numbers = #tpu.dot_dimension_numbers<[1], [0], [0], [1], [0, 0, 1, 1], [], []>} : vector<32x16xf32>, vector<16x32xf32>, vector<32x32xf32> -> vector<32x32xf32>
    %c1 = arith.constant 1 : index
    %c0_110 = arith.constant 0 : index
    %c0_111 = arith.constant 0 : index
    %214 = vector.load %arg4[%c1, %c0_110, %c0_111] : memref<2x32x32xf32, #tpu.memory_space<vmem>>, vector<1x32x32xf32>
    %215 = vector.shape_cast %214 : vector<1x32x32xf32> to vector<32x32xf32>
    %cst_112 = arith.constant dense<0.000000e+00> : vector<32x32xf32>
    %216 = tpu.matmul %213, %215, %cst_112 {dimension_numbers = #tpu.dot_dimension_numbers<[1], [0], [0], [1], [0, 0, 1, 1], [], []>} : vector<32x32xf32>, vector<32x32xf32>, vector<32x32xf32> -> vector<32x32xf32>
    %c1_113 = arith.constant 1 : index
    %c0_114 = arith.constant 0 : index
    %c0_115 = arith.constant 0 : index
    %217 = vector.load %arg6[%c1_113, %c0_114, %c0_115] : memref<2x16x32xf32, #tpu.memory_space<vmem>>, vector<1x16x32xf32>
    %218 = vector.shape_cast %217 : vector<1x16x32xf32> to vector<16x32xf32>
    %cst_116 = arith.constant dense<0.000000e+00> : vector<32x32xf32>
    %219 = tpu.matmul %1, %218, %cst_116 {dimension_numbers = #tpu.dot_dimension_numbers<[1], [0], [0], [1], [0, 0, 1, 1], [], []>} : vector<32x16xf32>, vector<16x32xf32>, vector<32x32xf32> -> vector<32x32xf32>
    %220 = arith.addf %216, %219 : vector<32x32xf32>
    %c1_117 = arith.constant 1 : index
    %c0_118 = arith.constant 0 : index
    %c0_119 = arith.constant 0 : index
    %221 = vector.load %arg5[%c1_117, %c0_118, %c0_119] : memref<2x1x32xf32, #tpu.memory_space<vmem>>, vector<1x1x32xf32>
    %222 = vector.shape_cast %221 : vector<1x1x32xf32> to vector<1x32xf32>
    %223 = vector.broadcast %222 : vector<1x32xf32> to vector<32x32xf32>
    %224 = arith.addf %220, %223 : vector<32x32xf32>
    %cst_120 = arith.constant 0.000000e+00 : f32
    %225 = vector.broadcast %cst_120 : f32 to vector<32x32xf32>
    %226 = arith.maximumf %224, %225 : vector<32x32xf32>
    %cst_121 = arith.constant dense<0.000000e+00> : vector<16x32xf32>
    %227 = tpu.matmul %11, %226, %cst_121 {dimension_numbers = #tpu.dot_dimension_numbers<[1], [0], [0], [1], [0, 0, 1, 1], [], []>} : vector<16x32xf32>, vector<32x32xf32>, vector<16x32xf32> -> vector<16x32xf32>
    %228 = arith.addf %206, %227 : vector<16x32xf32>
    %c1_122 = arith.constant 1 : index
    %c0_123 = arith.constant 0 : index
    %c0_124 = arith.constant 0 : index
    %229 = vector.load %arg7[%c1_122, %c0_123, %c0_124] : memref<2x32x32xf32, #tpu.memory_space<vmem>>, vector<1x32x32xf32>
    %230 = vector.shape_cast %229 : vector<1x32x32xf32> to vector<32x32xf32>
    %cst_125 = arith.constant dense<0.000000e+00> : vector<16x32xf32>
    %231 = tpu.matmul %228, %230, %cst_125 {dimension_numbers = #tpu.dot_dimension_numbers<[1], [0], [0], [1], [0, 0, 1, 1], [], []>} : vector<16x32xf32>, vector<32x32xf32>, vector<16x32xf32> -> vector<16x32xf32>
    %c1_126 = arith.constant 1 : index
    %c0_127 = arith.constant 0 : index
    %c0_128 = arith.constant 0 : index
    %232 = vector.load %arg8[%c1_126, %c0_127, %c0_128] : memref<2x1x32xf32, #tpu.memory_space<vmem>>, vector<1x1x32xf32>
    %233 = vector.shape_cast %232 : vector<1x1x32xf32> to vector<1x32xf32>
    %234 = vector.broadcast %233 : vector<1x32xf32> to vector<16x32xf32>
    %235 = arith.addf %231, %234 : vector<16x32xf32>
    %cst_129 = arith.constant 0.000000e+00 : f32
    %236 = vector.broadcast %cst_129 : f32 to vector<16x32xf32>
    %237 = arith.maximumf %235, %236 : vector<16x32xf32>
    %c1_130 = arith.constant 1 : index
    %c0_131 = arith.constant 0 : index
    %c0_132 = arith.constant 0 : index
    %238 = vector.load %arg9[%c1_130, %c0_131, %c0_132] : memref<2x32x96xf32, #tpu.memory_space<vmem>>, vector<1x32x96xf32>
    %239 = vector.shape_cast %238 : vector<1x32x96xf32> to vector<32x96xf32>
    %cst_133 = arith.constant dense<0.000000e+00> : vector<16x96xf32>
    %240 = tpu.matmul %206, %239, %cst_133 {dimension_numbers = #tpu.dot_dimension_numbers<[1], [0], [0], [1], [0, 0, 1, 1], [], []>} : vector<16x32xf32>, vector<32x96xf32>, vector<16x96xf32> -> vector<16x96xf32>
    %c1_134 = arith.constant 1 : index
    %c0_135 = arith.constant 0 : index
    %c0_136 = arith.constant 0 : index
    %241 = vector.load %arg10[%c1_134, %c0_135, %c0_136] : memref<2x1x96xf32, #tpu.memory_space<vmem>>, vector<1x1x96xf32>
    %242 = vector.shape_cast %241 : vector<1x1x96xf32> to vector<1x96xf32>
    %243 = vector.broadcast %242 : vector<1x96xf32> to vector<16x96xf32>
    %244 = arith.addf %240, %243 : vector<16x96xf32>
    %c1_137 = arith.constant 1 : index
    %c0_138 = arith.constant 0 : index
    %c0_139 = arith.constant 0 : index
    %245 = vector.load %arg12[%c1_137, %c0_138, %c0_139] : memref<2x1x32xf32, #tpu.memory_space<vmem>>, vector<1x1x32xf32>
    %246 = vector.shape_cast %245 : vector<1x1x32xf32> to vector<1x32xf32>
    %cst_140 = arith.constant 0.000000e+00 : f32
    %247 = vector.broadcast %cst_140 : f32 to vector<16x32xf32>
    %248 = vector.broadcast %246 : vector<1x32xf32> to vector<16x32xf32>
    %249 = arith.addf %248, %247 : vector<16x32xf32>
    %c1_141 = arith.constant 1 : index
    %c0_142 = arith.constant 0 : index
    %c0_143 = arith.constant 0 : index
    %250 = vector.load %arg11[%c1_141, %c0_142, %c0_143] : memref<2x32x32xf32, #tpu.memory_space<vmem>>, vector<1x32x32xf32>
    %251 = vector.shape_cast %250 : vector<1x32x32xf32> to vector<32x32xf32>
    %252 = vector.extract_strided_slice %244 {offsets = [0, 0], sizes = [16, 8], strides = [1, 1]} : vector<16x96xf32> to vector<16x8xf32>
    %253 = vector.extract_strided_slice %244 {offsets = [0, 32], sizes = [16, 8], strides = [1, 1]} : vector<16x96xf32> to vector<16x8xf32>
    %254 = vector.extract_strided_slice %244 {offsets = [0, 64], sizes = [16, 8], strides = [1, 1]} : vector<16x96xf32> to vector<16x8xf32>
    %cst_144 = arith.constant dense<0.000000e+00> : vector<16x16xf32>
    %255 = tpu.matmul %252, %253, %cst_144 {dimension_numbers = #tpu.dot_dimension_numbers<[1], [1], [0], [0], [0, 0, 1, 0], [], []>} : vector<16x8xf32>, vector<16x8xf32>, vector<16x16xf32> -> vector<16x16xf32>
    %cst_145 = arith.constant 0.353553385 : f32
    %256 = vector.broadcast %cst_145 : f32 to vector<16x16xf32>
    %257 = arith.mulf %255, %256 : vector<16x16xf32>
    %cst_146 = arith.constant dense<0xFF800000> : vector<16xf32>
    %258 = vector.multi_reduction <maximumf>, %257, %cst_146 [1] : vector<16x16xf32> to vector<16xf32>
    %259 = vector.shape_cast %258 : vector<16xf32> to vector<16x1xf32>
    %260 = vector.broadcast %259 : vector<16x1xf32> to vector<16x16xf32>
    %261 = arith.subf %257, %260 : vector<16x16xf32>
    %262 = math.exp %261 : vector<16x16xf32>
    %cst_147 = arith.constant dense<0.000000e+00> : vector<16xf32>
    %263 = vector.multi_reduction <add>, %262, %cst_147 [1] : vector<16x16xf32> to vector<16xf32>
    %264 = vector.shape_cast %263 : vector<16xf32> to vector<16x1xf32>
    %265 = tpu.reciprocal %264 {approx = true} : vector<16x1xf32> -> vector<16x1xf32>
    %266 = vector.broadcast %265 : vector<16x1xf32> to vector<16x16xf32>
    %267 = arith.mulf %262, %266 : vector<16x16xf32>
    %cst_148 = arith.constant dense<0.000000e+00> : vector<16x8xf32>
    %268 = tpu.matmul %267, %254, %cst_148 {dimension_numbers = #tpu.dot_dimension_numbers<[1], [0], [0], [1], [0, 0, 1, 1], [], []>} : vector<16x16xf32>, vector<16x8xf32>, vector<16x8xf32> -> vector<16x8xf32>
    %269 = vector.extract_strided_slice %251 {offsets = [0, 0], sizes = [8, 32], strides = [1, 1]} : vector<32x32xf32> to vector<8x32xf32>
    %cst_149 = arith.constant dense<0.000000e+00> : vector<16x32xf32>
    %270 = tpu.matmul %268, %269, %cst_149 {dimension_numbers = #tpu.dot_dimension_numbers<[1], [0], [0], [1], [0, 0, 1, 1], [], []>} : vector<16x8xf32>, vector<8x32xf32>, vector<16x32xf32> -> vector<16x32xf32>
    %271 = arith.addf %249, %270 : vector<16x32xf32>
    %272 = vector.extract_strided_slice %244 {offsets = [0, 8], sizes = [16, 8], strides = [1, 1]} : vector<16x96xf32> to vector<16x8xf32>
    %273 = vector.extract_strided_slice %244 {offsets = [0, 40], sizes = [16, 8], strides = [1, 1]} : vector<16x96xf32> to vector<16x8xf32>
    %274 = vector.extract_strided_slice %244 {offsets = [0, 72], sizes = [16, 8], strides = [1, 1]} : vector<16x96xf32> to vector<16x8xf32>
    %cst_150 = arith.constant dense<0.000000e+00> : vector<16x16xf32>
    %275 = tpu.matmul %272, %273, %cst_150 {dimension_numbers = #tpu.dot_dimension_numbers<[1], [1], [0], [0], [0, 0, 1, 0], [], []>} : vector<16x8xf32>, vector<16x8xf32>, vector<16x16xf32> -> vector<16x16xf32>
    %cst_151 = arith.constant 0.353553385 : f32
    %276 = vector.broadcast %cst_151 : f32 to vector<16x16xf32>
    %277 = arith.mulf %275, %276 : vector<16x16xf32>
    %cst_152 = arith.constant dense<0xFF800000> : vector<16xf32>
    %278 = vector.multi_reduction <maximumf>, %277, %cst_152 [1] : vector<16x16xf32> to vector<16xf32>
    %279 = vector.shape_cast %278 : vector<16xf32> to vector<16x1xf32>
    %280 = vector.broadcast %279 : vector<16x1xf32> to vector<16x16xf32>
    %281 = arith.subf %277, %280 : vector<16x16xf32>
    %282 = math.exp %281 : vector<16x16xf32>
    %cst_153 = arith.constant dense<0.000000e+00> : vector<16xf32>
    %283 = vector.multi_reduction <add>, %282, %cst_153 [1] : vector<16x16xf32> to vector<16xf32>
    %284 = vector.shape_cast %283 : vector<16xf32> to vector<16x1xf32>
    %285 = tpu.reciprocal %284 {approx = true} : vector<16x1xf32> -> vector<16x1xf32>
    %286 = vector.broadcast %285 : vector<16x1xf32> to vector<16x16xf32>
    %287 = arith.mulf %282, %286 : vector<16x16xf32>
    %cst_154 = arith.constant dense<0.000000e+00> : vector<16x8xf32>
    %288 = tpu.matmul %287, %274, %cst_154 {dimension_numbers = #tpu.dot_dimension_numbers<[1], [0], [0], [1], [0, 0, 1, 1], [], []>} : vector<16x16xf32>, vector<16x8xf32>, vector<16x8xf32> -> vector<16x8xf32>
    %289 = vector.extract_strided_slice %251 {offsets = [8, 0], sizes = [8, 32], strides = [1, 1]} : vector<32x32xf32> to vector<8x32xf32>
    %cst_155 = arith.constant dense<0.000000e+00> : vector<16x32xf32>
    %290 = tpu.matmul %288, %289, %cst_155 {dimension_numbers = #tpu.dot_dimension_numbers<[1], [0], [0], [1], [0, 0, 1, 1], [], []>} : vector<16x8xf32>, vector<8x32xf32>, vector<16x32xf32> -> vector<16x32xf32>
    %291 = arith.addf %271, %290 : vector<16x32xf32>
    %292 = vector.extract_strided_slice %244 {offsets = [0, 16], sizes = [16, 8], strides = [1, 1]} : vector<16x96xf32> to vector<16x8xf32>
    %293 = vector.extract_strided_slice %244 {offsets = [0, 48], sizes = [16, 8], strides = [1, 1]} : vector<16x96xf32> to vector<16x8xf32>
    %294 = vector.extract_strided_slice %244 {offsets = [0, 80], sizes = [16, 8], strides = [1, 1]} : vector<16x96xf32> to vector<16x8xf32>
    %cst_156 = arith.constant dense<0.000000e+00> : vector<16x16xf32>
    %295 = tpu.matmul %292, %293, %cst_156 {dimension_numbers = #tpu.dot_dimension_numbers<[1], [1], [0], [0], [0, 0, 1, 0], [], []>} : vector<16x8xf32>, vector<16x8xf32>, vector<16x16xf32> -> vector<16x16xf32>
    %cst_157 = arith.constant 0.353553385 : f32
    %296 = vector.broadcast %cst_157 : f32 to vector<16x16xf32>
    %297 = arith.mulf %295, %296 : vector<16x16xf32>
    %cst_158 = arith.constant dense<0xFF800000> : vector<16xf32>
    %298 = vector.multi_reduction <maximumf>, %297, %cst_158 [1] : vector<16x16xf32> to vector<16xf32>
    %299 = vector.shape_cast %298 : vector<16xf32> to vector<16x1xf32>
    %300 = vector.broadcast %299 : vector<16x1xf32> to vector<16x16xf32>
    %301 = arith.subf %297, %300 : vector<16x16xf32>
    %302 = math.exp %301 : vector<16x16xf32>
    %cst_159 = arith.constant dense<0.000000e+00> : vector<16xf32>
    %303 = vector.multi_reduction <add>, %302, %cst_159 [1] : vector<16x16xf32> to vector<16xf32>
    %304 = vector.shape_cast %303 : vector<16xf32> to vector<16x1xf32>
    %305 = tpu.reciprocal %304 {approx = true} : vector<16x1xf32> -> vector<16x1xf32>
    %306 = vector.broadcast %305 : vector<16x1xf32> to vector<16x16xf32>
    %307 = arith.mulf %302, %306 : vector<16x16xf32>
    %cst_160 = arith.constant dense<0.000000e+00> : vector<16x8xf32>
    %308 = tpu.matmul %307, %294, %cst_160 {dimension_numbers = #tpu.dot_dimension_numbers<[1], [0], [0], [1], [0, 0, 1, 1], [], []>} : vector<16x16xf32>, vector<16x8xf32>, vector<16x8xf32> -> vector<16x8xf32>
    %309 = vector.extract_strided_slice %251 {offsets = [16, 0], sizes = [8, 32], strides = [1, 1]} : vector<32x32xf32> to vector<8x32xf32>
    %cst_161 = arith.constant dense<0.000000e+00> : vector<16x32xf32>
    %310 = tpu.matmul %308, %309, %cst_161 {dimension_numbers = #tpu.dot_dimension_numbers<[1], [0], [0], [1], [0, 0, 1, 1], [], []>} : vector<16x8xf32>, vector<8x32xf32>, vector<16x32xf32> -> vector<16x32xf32>
    %311 = arith.addf %291, %310 : vector<16x32xf32>
    %312 = vector.extract_strided_slice %244 {offsets = [0, 24], sizes = [16, 8], strides = [1, 1]} : vector<16x96xf32> to vector<16x8xf32>
    %313 = vector.extract_strided_slice %244 {offsets = [0, 56], sizes = [16, 8], strides = [1, 1]} : vector<16x96xf32> to vector<16x8xf32>
    %314 = vector.extract_strided_slice %244 {offsets = [0, 88], sizes = [16, 8], strides = [1, 1]} : vector<16x96xf32> to vector<16x8xf32>
    %cst_162 = arith.constant dense<0.000000e+00> : vector<16x16xf32>
    %315 = tpu.matmul %312, %313, %cst_162 {dimension_numbers = #tpu.dot_dimension_numbers<[1], [1], [0], [0], [0, 0, 1, 0], [], []>} : vector<16x8xf32>, vector<16x8xf32>, vector<16x16xf32> -> vector<16x16xf32>
    %cst_163 = arith.constant 0.353553385 : f32
    %316 = vector.broadcast %cst_163 : f32 to vector<16x16xf32>
    %317 = arith.mulf %315, %316 : vector<16x16xf32>
    %cst_164 = arith.constant dense<0xFF800000> : vector<16xf32>
    %318 = vector.multi_reduction <maximumf>, %317, %cst_164 [1] : vector<16x16xf32> to vector<16xf32>
    %319 = vector.shape_cast %318 : vector<16xf32> to vector<16x1xf32>
    %320 = vector.broadcast %319 : vector<16x1xf32> to vector<16x16xf32>
    %321 = arith.subf %317, %320 : vector<16x16xf32>
    %322 = math.exp %321 : vector<16x16xf32>
    %cst_165 = arith.constant dense<0.000000e+00> : vector<16xf32>
    %323 = vector.multi_reduction <add>, %322, %cst_165 [1] : vector<16x16xf32> to vector<16xf32>
    %324 = vector.shape_cast %323 : vector<16xf32> to vector<16x1xf32>
    %325 = tpu.reciprocal %324 {approx = true} : vector<16x1xf32> -> vector<16x1xf32>
    %326 = vector.broadcast %325 : vector<16x1xf32> to vector<16x16xf32>
    %327 = arith.mulf %322, %326 : vector<16x16xf32>
    %cst_166 = arith.constant dense<0.000000e+00> : vector<16x8xf32>
    %328 = tpu.matmul %327, %314, %cst_166 {dimension_numbers = #tpu.dot_dimension_numbers<[1], [0], [0], [1], [0, 0, 1, 1], [], []>} : vector<16x16xf32>, vector<16x8xf32>, vector<16x8xf32> -> vector<16x8xf32>
    %329 = vector.extract_strided_slice %251 {offsets = [24, 0], sizes = [8, 32], strides = [1, 1]} : vector<32x32xf32> to vector<8x32xf32>
    %cst_167 = arith.constant dense<0.000000e+00> : vector<16x32xf32>
    %330 = tpu.matmul %328, %329, %cst_167 {dimension_numbers = #tpu.dot_dimension_numbers<[1], [0], [0], [1], [0, 0, 1, 1], [], []>} : vector<16x8xf32>, vector<8x32xf32>, vector<16x32xf32> -> vector<16x32xf32>
    %331 = arith.addf %311, %330 : vector<16x32xf32>
    %332 = arith.addf %206, %237 : vector<16x32xf32>
    %333 = arith.addf %332, %331 : vector<16x32xf32>
    %c1_168 = arith.constant 1 : index
    %c0_169 = arith.constant 0 : index
    %c0_170 = arith.constant 0 : index
    %334 = vector.load %arg17[%c1_168, %c0_169, %c0_170] : memref<2x1x32xf32, #tpu.memory_space<vmem>>, vector<1x1x32xf32>
    %335 = vector.shape_cast %334 : vector<1x1x32xf32> to vector<1x32xf32>
    %c1_171 = arith.constant 1 : index
    %c0_172 = arith.constant 0 : index
    %c0_173 = arith.constant 0 : index
    %336 = vector.load %arg18[%c1_171, %c0_172, %c0_173] : memref<2x1x32xf32, #tpu.memory_space<vmem>>, vector<1x1x32xf32>
    %337 = vector.shape_cast %336 : vector<1x1x32xf32> to vector<1x32xf32>
    %cst_174 = arith.constant dense<0.000000e+00> : vector<16xf32>
    %338 = vector.multi_reduction <add>, %333, %cst_174 [1] : vector<16x32xf32> to vector<16xf32>
    %339 = vector.shape_cast %338 : vector<16xf32> to vector<16x1xf32>
    %cst_175 = arith.constant 3.200000e+01 : f32
    %340 = vector.broadcast %cst_175 : f32 to vector<16x1xf32>
    %341 = arith.divf %339, %340 : vector<16x1xf32>
    %342 = vector.broadcast %341 : vector<16x1xf32> to vector<16x32xf32>
    %343 = arith.subf %333, %342 : vector<16x32xf32>
    %344 = arith.mulf %343, %343 : vector<16x32xf32>
    %cst_176 = arith.constant dense<0.000000e+00> : vector<16xf32>
    %345 = vector.multi_reduction <add>, %344, %cst_176 [1] : vector<16x32xf32> to vector<16xf32>
    %346 = vector.shape_cast %345 : vector<16xf32> to vector<16x1xf32>
    %cst_177 = arith.constant 3.200000e+01 : f32
    %347 = vector.broadcast %cst_177 : f32 to vector<16x1xf32>
    %348 = arith.divf %346, %347 : vector<16x1xf32>
    %349 = vector.broadcast %341 : vector<16x1xf32> to vector<16x32xf32>
    %350 = arith.subf %333, %349 : vector<16x32xf32>
    %cst_178 = arith.constant 9.99999974E-6 : f32
    %351 = vector.broadcast %cst_178 : f32 to vector<16x1xf32>
    %352 = arith.addf %348, %351 : vector<16x1xf32>
    %353 = math.rsqrt %352 : vector<16x1xf32>
    %354 = vector.broadcast %353 : vector<16x1xf32> to vector<16x32xf32>
    %355 = arith.mulf %350, %354 : vector<16x32xf32>
    %356 = vector.broadcast %335 : vector<1x32xf32> to vector<16x32xf32>
    %357 = arith.mulf %355, %356 : vector<16x32xf32>
    %358 = vector.broadcast %337 : vector<1x32xf32> to vector<16x32xf32>
    %359 = arith.addf %357, %358 : vector<16x32xf32>
    %c1_179 = arith.constant 1 : index
    %c0_180 = arith.constant 0 : index
    %c0_181 = arith.constant 0 : index
    %360 = vector.load %arg13[%c1_179, %c0_180, %c0_181] : memref<2x32x64xf32, #tpu.memory_space<vmem>>, vector<1x32x64xf32>
    %361 = vector.shape_cast %360 : vector<1x32x64xf32> to vector<32x64xf32>
    %cst_182 = arith.constant dense<0.000000e+00> : vector<16x64xf32>
    %362 = tpu.matmul %359, %361, %cst_182 {dimension_numbers = #tpu.dot_dimension_numbers<[1], [0], [0], [1], [0, 0, 1, 1], [], []>} : vector<16x32xf32>, vector<32x64xf32>, vector<16x64xf32> -> vector<16x64xf32>
    %c1_183 = arith.constant 1 : index
    %c0_184 = arith.constant 0 : index
    %c0_185 = arith.constant 0 : index
    %363 = vector.load %arg14[%c1_183, %c0_184, %c0_185] : memref<2x1x64xf32, #tpu.memory_space<vmem>>, vector<1x1x64xf32>
    %364 = vector.shape_cast %363 : vector<1x1x64xf32> to vector<1x64xf32>
    %365 = vector.broadcast %364 : vector<1x64xf32> to vector<16x64xf32>
    %366 = arith.addf %362, %365 : vector<16x64xf32>
    %cst_186 = arith.constant 0.000000e+00 : f32
    %367 = vector.broadcast %cst_186 : f32 to vector<16x64xf32>
    %368 = arith.maximumf %366, %367 : vector<16x64xf32>
    %c1_187 = arith.constant 1 : index
    %c0_188 = arith.constant 0 : index
    %c0_189 = arith.constant 0 : index
    %369 = vector.load %arg15[%c1_187, %c0_188, %c0_189] : memref<2x64x32xf32, #tpu.memory_space<vmem>>, vector<1x64x32xf32>
    %370 = vector.shape_cast %369 : vector<1x64x32xf32> to vector<64x32xf32>
    %cst_190 = arith.constant dense<0.000000e+00> : vector<16x32xf32>
    %371 = tpu.matmul %368, %370, %cst_190 {dimension_numbers = #tpu.dot_dimension_numbers<[1], [0], [0], [1], [0, 0, 1, 1], [], []>} : vector<16x64xf32>, vector<64x32xf32>, vector<16x32xf32> -> vector<16x32xf32>
    %c1_191 = arith.constant 1 : index
    %c0_192 = arith.constant 0 : index
    %c0_193 = arith.constant 0 : index
    %372 = vector.load %arg16[%c1_191, %c0_192, %c0_193] : memref<2x1x32xf32, #tpu.memory_space<vmem>>, vector<1x1x32xf32>
    %373 = vector.shape_cast %372 : vector<1x1x32xf32> to vector<1x32xf32>
    %374 = vector.broadcast %373 : vector<1x32xf32> to vector<16x32xf32>
    %375 = arith.addf %371, %374 : vector<16x32xf32>
    %376 = arith.addf %359, %375 : vector<16x32xf32>
    %c1_194 = arith.constant 1 : index
    %c0_195 = arith.constant 0 : index
    %c0_196 = arith.constant 0 : index
    %377 = vector.load %arg19[%c1_194, %c0_195, %c0_196] : memref<2x1x32xf32, #tpu.memory_space<vmem>>, vector<1x1x32xf32>
    %378 = vector.shape_cast %377 : vector<1x1x32xf32> to vector<1x32xf32>
    %c1_197 = arith.constant 1 : index
    %c0_198 = arith.constant 0 : index
    %c0_199 = arith.constant 0 : index
    %379 = vector.load %arg20[%c1_197, %c0_198, %c0_199] : memref<2x1x32xf32, #tpu.memory_space<vmem>>, vector<1x1x32xf32>
    %380 = vector.shape_cast %379 : vector<1x1x32xf32> to vector<1x32xf32>
    %cst_200 = arith.constant dense<0.000000e+00> : vector<16xf32>
    %381 = vector.multi_reduction <add>, %376, %cst_200 [1] : vector<16x32xf32> to vector<16xf32>
    %382 = vector.shape_cast %381 : vector<16xf32> to vector<16x1xf32>
    %cst_201 = arith.constant 3.200000e+01 : f32
    %383 = vector.broadcast %cst_201 : f32 to vector<16x1xf32>
    %384 = arith.divf %382, %383 : vector<16x1xf32>
    %385 = vector.broadcast %384 : vector<16x1xf32> to vector<16x32xf32>
    %386 = arith.subf %376, %385 : vector<16x32xf32>
    %387 = arith.mulf %386, %386 : vector<16x32xf32>
    %cst_202 = arith.constant dense<0.000000e+00> : vector<16xf32>
    %388 = vector.multi_reduction <add>, %387, %cst_202 [1] : vector<16x32xf32> to vector<16xf32>
    %389 = vector.shape_cast %388 : vector<16xf32> to vector<16x1xf32>
    %cst_203 = arith.constant 3.200000e+01 : f32
    %390 = vector.broadcast %cst_203 : f32 to vector<16x1xf32>
    %391 = arith.divf %389, %390 : vector<16x1xf32>
    %392 = vector.broadcast %384 : vector<16x1xf32> to vector<16x32xf32>
    %393 = arith.subf %376, %392 : vector<16x32xf32>
    %cst_204 = arith.constant 9.99999974E-6 : f32
    %394 = vector.broadcast %cst_204 : f32 to vector<16x1xf32>
    %395 = arith.addf %391, %394 : vector<16x1xf32>
    %396 = math.rsqrt %395 : vector<16x1xf32>
    %397 = vector.broadcast %396 : vector<16x1xf32> to vector<16x32xf32>
    %398 = arith.mulf %393, %397 : vector<16x32xf32>
    %399 = vector.broadcast %378 : vector<1x32xf32> to vector<16x32xf32>
    %400 = arith.mulf %398, %399 : vector<16x32xf32>
    %401 = vector.broadcast %380 : vector<1x32xf32> to vector<16x32xf32>
    %402 = arith.addf %400, %401 : vector<16x32xf32>
    %c0_205 = arith.constant 0 : index
    %c0_206 = arith.constant 0 : index
    %403 = vector.load %arg21[%c0_205, %c0_206] : memref<32x4xf32, #tpu.memory_space<vmem>>, vector<32x4xf32>
    %cst_207 = arith.constant dense<0.000000e+00> : vector<16x4xf32>
    %404 = tpu.matmul %402, %403, %cst_207 {dimension_numbers = #tpu.dot_dimension_numbers<[1], [0], [0], [1], [0, 0, 1, 1], [], []>} : vector<16x32xf32>, vector<32x4xf32>, vector<16x4xf32> -> vector<16x4xf32>
    %405 = arith.addf %212, %404 : vector<16x4xf32>
    %c0_208 = arith.constant 0 : index
    %c0_209 = arith.constant 0 : index
    %406 = vector.load %arg22[%c0_208, %c0_209] : memref<1x4xf32, #tpu.memory_space<vmem>>, vector<1x4xf32>
    %407 = vector.broadcast %406 : vector<1x4xf32> to vector<16x4xf32>
    %408 = arith.addf %405, %407 : vector<16x4xf32>
    %409 = tpu.iota {dimensions = array<i32: 0>} : vector<4x36xi32>
    %410 = tpu.iota {dimensions = array<i32: 1>} : vector<4x36xi32>
    %411 = arith.cmpi eq, %409, %410 : vector<4x36xi32>
    %412 = arith.extui %411 : vector<4x36xi1> to vector<4x36xi32>
    %413 = arith.sitofp %412 : vector<4x36xi32> to vector<4x36xf32>
    %414 = tpu.iota {dimensions = array<i32: 0>} : vector<32x36xi32>
    %415 = tpu.iota {dimensions = array<i32: 1>} : vector<32x36xi32>
    %c4_i32 = arith.constant 4 : i32
    %416 = vector.broadcast %c4_i32 : i32 to vector<32x36xi32>
    %417 = arith.addi %414, %416 : vector<32x36xi32>
    %418 = arith.cmpi eq, %417, %415 : vector<32x36xi32>
    %419 = arith.extui %418 : vector<32x36xi1> to vector<32x36xi32>
    %420 = arith.sitofp %419 : vector<32x36xi32> to vector<32x36xf32>
    %cst_210 = arith.constant dense<0.000000e+00> : vector<16x36xf32>
    %421 = tpu.matmul %408, %413, %cst_210 {dimension_numbers = #tpu.dot_dimension_numbers<[1], [0], [0], [1], [0, 0, 1, 1], [], []>} : vector<16x4xf32>, vector<4x36xf32>, vector<16x36xf32> -> vector<16x36xf32>
    %cst_211 = arith.constant dense<0.000000e+00> : vector<16x36xf32>
    %422 = tpu.matmul %402, %420, %cst_211 {dimension_numbers = #tpu.dot_dimension_numbers<[1], [0], [0], [1], [0, 0, 1, 1], [], []>} : vector<16x32xf32>, vector<32x36xf32>, vector<16x36xf32> -> vector<16x36xf32>
    %423 = arith.addf %421, %422 : vector<16x36xf32>
    %c0_212 = arith.constant 0 : index
    %c0_213 = arith.constant 0 : index
    %424 = vector.load %arg23[%c0_212, %c0_213] : memref<16x36xf32, #tpu.memory_space<vmem>>, vector<16x36xf32>
    tpu.vector_store %arg23[%c0_212, %c0_213], %423 {strides = array<i32>} : memref<16x36xf32, #tpu.memory_space<vmem>>, vector<16x36xf32>,
    return
  }
}

</mosaic_0001>

<bundles_post_ra>
// kernel: forward.1
= control target key start
LH: loop header
LB: loop body
LE: loop exit
PB: predicated region body
PF: predicated region fallthrough
CT: control target
= control target key end

     0   :  { %s3741_s0 = inlined_call_operand.hbm [shape: f32[16,32], index: 0, kind: input, shape index: {}]   ;;  %s3742_s1 = inlined_call_operand.vmem [shape: s32[2,32], index: 1, kind: input, shape index: {}]   ;;  %s3743_s2 = inlined_call_operand.vmem [shape: s32[32,2], index: 2, kind: input, shape index: {}]   ;;  %s3744_s3 = inlined_call_operand.vmem [shape: f32[32,16], index: 3, kind: input, shape index: {}]   ;;  %s3745_s4 = inlined_call_operand.vmem [shape: f32[2,32,32], index: 4, kind: input, shape index: {}]   ;;  %s3746_s5 = inlined_call_operand.vmem [shape: f32[2,1,32], index: 5, kind: input, shape index: {}]   ;;  %s3747_s6 = inlined_call_operand.vmem [shape: f32[2,16,32], index: 6, kind: input, shape index: {}]   ;;  %s3748_s7 = inlined_call_operand.vmem [shape: f32[2,32,32], index: 7, kind: input, shape index: {}]   ;;  %s3749_s8 = inlined_call_operand.vmem [shape: f32[2,1,32], index: 8, kind: input, shape index: {}]   ;;  %s3750_s9 = inlined_call_operand.vmem [shape: f32[2,32,96], index: 9, kind: input, shape index: {}]   ;;  %s3751_s10 = inlined_call_operand.vmem [shape: f32[2,1,96], index: 10, kind: input, shape index: {}]   ;;  %s3752_s11 = inlined_call_operand.hbm [shape: f32[2,32,32], index: 11, kind: input, shape index: {}]   ;;  %s3753_s12 = inlined_call_operand.vmem [shape: f32[2,1,32], index: 12, kind: input, shape index: {}]   ;;  %s3754_s13 = inlined_call_operand.hbm [shape: f32[2,32,64], index: 13, kind: input, shape index: {}]   ;;  %s3755_s14 = inlined_call_operand.vmem [shape: f32[2,1,64], index: 14, kind: input, shape index: {}]   ;;  %s3756_s15 = inlined_call_operand.vmem [shape: f32[2,64,32], index: 15, kind: input, shape index: {}]   ;;  %s3757_s16 = inlined_call_operand.hbm [shape: f32[2,1,32], index: 16, kind: input, shape index: {}]   ;;  %s3758_s17 = inlined_call_operand.hbm [shape: f32[2,1,32], index: 17, kind: input, shape index: {}]   ;;  %s3759_s18 = inlined_call_operand.hbm [shape: f32[2,1,32], index: 18, kind: input, shape index: {}]   ;;  %s3760_s19 = inlined_call_operand.hbm [shape: f32[2,1,32], index: 19, kind: input, shape index: {}]   ;;  %s3761_s20 = inlined_call_operand.hbm [shape: f32[2,1,32], index: 20, kind: input, shape index: {}]   ;;  %s3762_s21 = inlined_call_operand.vmem [shape: f32[32,4], index: 21, kind: input, shape index: {}]   ;;  %s3763_s22 = inlined_call_operand.vmem [shape: f32[1,4], index: 22, kind: input, shape index: {}]   ;;  %s3764_s23 = inlined_call_operand.hbm [shape: f32[16,36], index: 23, kind: output, shape index: {}]  }
   0x1   :  { %3775 = sst [smem:[#allocation23_spill]] %s3741_s0 }
   0x2   :  { %3776 = sst [smem:[#allocation24_spill]] %s3742_s1 }
   0x3   :  { %3777 = sst [smem:[#allocation25_spill]] %s3743_s2 }
   0x4   :  { %3778 = sst [smem:[#allocation26_spill]] %s3744_s3 }
   0x5   :  { %3779 = sst [smem:[#allocation27_spill]] %s3745_s4 }
   0x6   :  { %3780 = sst [smem:[#allocation28_spill]] %s3746_s5 }
   0x7   :  { %3781 = sst [smem:[#allocation29_spill]] %s3747_s6 }
   0x8   :  { %3782 = sst [smem:[#allocation30_spill]] %s3748_s7 }
   0x9   :  { %28 = vsyncpa [#allocation3], 0 }
   0xa   :  { %29 = vsyncpa [#allocation6], 0 }
   0xb   :  { %30 = vsyncpa [#allocation9], 0 }
   0xc   :  { %31 = vsyncpa [#allocation12], 0 }
   0xd   :  { %32 = vsyncpa [#allocation15], 0 }
   0xe   :  { %33 = vsyncpa [#allocation4], 0  ;;  %s71_s24 = sshll.u32 %s3752_s11, 4  ;;  %s2921_s25 = smov [#allocation5]   ;;  %s72_s24 = int_to_ptr.hbm [resolvable:$true] %s71_s24 }
   0xf   :  { %s73_s5 = sshll.u32 %s2921_s25, 4  ;;  %s103_s2 = sshll.u32 %s3757_s16, 4  ;;  %s74_s5 = int_to_ptr.vmem [resolvable:$true] %s73_s5  ;;  %s104_s2 = int_to_ptr.hbm [resolvable:$true] %s103_s2 }
  0x10   :  { %s3771_s6 = smov 128   ;;  %s3772_s27 = smov 8  }
  0x11   :  { %79 = dma.hbm_to_vmem [thread:$0]  %s72_s24, 1024, %s74_s5, [#allocation6], %s3771_s6, %s3771_s6, %s3772_s27  }
  0x12   :  { %s2924_s7 = smov [#allocation8]   ;;  %s2925_s29 = smov 16  }
  0x13   :  { %s105_s28 = sshll.u32 %s2924_s7, 4  ;;  %s2926_s11 = smov 1   ;;  %s106_s28 = int_to_ptr.vmem [resolvable:$true] %s105_s28 }
  0x14   :  { %111 = dma.hbm_to_vmem [thread:$0]  %s104_s2, 32, %s106_s28, [#allocation9], %s2925_s29, %s2925_s29, %s2926_s11  }
  0x15   :  { %s129_s16 = sshll.u32 %s3759_s18, 4  ;;  %s2927_s4 = smov [#allocation11]   ;;  %s130_s16 = int_to_ptr.hbm [resolvable:$true] %s129_s16 }
  0x16   :  { %s131_s30 = sshll.u32 %s2927_s4, 4  ;;  %s3783_s5 = sld [smem:[#allocation23_spill]]  ;;  %s132_s30 = int_to_ptr.vmem [resolvable:$true] %s131_s30 }
  0x17   :  { %137 = dma.hbm_to_vmem [thread:$0]  %s130_s16, 32, %s132_s30, [#allocation12], %s2925_s29, %s2925_s29, %s2926_s11  }
  0x18   :  { %s2928_s26 = smov [#allocation2]   ;;  %s86_s3 = sshll.u32 %s3754_s13, 4  ;;  %s87_s3 = int_to_ptr.hbm [resolvable:$true] %s86_s3 }
  0x19   :  { %s40_s7 = sshll.u32 %s2928_s26, 4  ;;  %s116_s4 = sshll.u32 %s3758_s17, 4  ;;  %s41_s7 = int_to_ptr.vmem [resolvable:$true] %s40_s7  ;;  %s117_s4 = int_to_ptr.hbm [resolvable:$true] %s116_s4 }
  0x1a   :  { %s2929_s25 = smov [#allocation7]   ;;  %s2930_s16 = smov [#allocation10]  }
  0x1b   :  { %s88_s24 = sshll.u32 %s2929_s25, 4  ;;  %s118_s13 = sshll.u32 %s2930_s16, 4  ;;  %s89_s24 = int_to_ptr.vmem [resolvable:$true] %s88_s24  ;;  %s119_s13 = int_to_ptr.vmem [resolvable:$true] %s118_s13 }
  0x1c   :  { %s38_s1 = sshll.u32 %s3783_s5, 4  ;;  %s142_s26 = sshll.u32 %s3760_s19, 4  ;;  %s39_s1 = int_to_ptr.hbm [resolvable:$true] %s38_s1  ;;  %s143_s26 = int_to_ptr.hbm [resolvable:$true] %s142_s26 }
  0x1d   :  { %46 = dma.hbm_to_vmem [thread:$0]  %s39_s1, 256, %s41_s7, [#allocation3], %s3771_s6, %s3771_s6, %s3772_s27  }
  0x1e   :  { %94 = dma.hbm_to_vmem [thread:$0]  %s87_s3, 1024, %s89_s24, [#allocation6], %s3771_s6, %s3771_s6, %s3772_s27  }
  0x1f   :  { %124 = dma.hbm_to_vmem [thread:$0]  %s117_s4, 32, %s119_s13, [#allocation9], %s2925_s29, %s2925_s29, %s2926_s11  }
  0x20   :  { %s155_s7 = sshll.u32 %s3761_s20, 4  ;;  %s2931_s2 = smov [#allocation13]   ;;  %s156_s7 = int_to_ptr.hbm [resolvable:$true] %s155_s7 }
  0x21   :  { %s144_s28 = sshll.u32 %s2931_s2, 4  ;;  %s2932_s3 = smov [#allocation14]   ;;  %s145_s28 = int_to_ptr.vmem [resolvable:$true] %s144_s28 }
  0x22   :  { %150 = dma.hbm_to_vmem [thread:$0]  %s143_s26, 32, %s145_s28, [#allocation12], %s2925_s29, %s2925_s29, %s2926_s11  }
  0x23   :  { %s157_s19 = sshll.u32 %s2932_s3, 4  ;;  %s158_s19 = int_to_ptr.vmem [resolvable:$true] %s157_s19 }
  0x24   :  { %163 = dma.hbm_to_vmem [thread:$0]  %s156_s7, 32, %s158_s19, [#allocation15], %s2925_s29, %s2925_s29, %s2926_s11  }
  0x25   :  { %2909 = dma.done.wait [#allocation3], 256  }
  0x26   :  { %2910 = vsyncadd [#allocation3], 4294967040 }
  0x27   :  { %2911 = dma.done.wait [#allocation6], 2048  }
  0x28   :  { %2912 = vsyncadd [#allocation6], 4294965248 }
  0x29   :  { %2913 = dma.done.wait [#allocation9], 64  }
  0x2a   :  { %2914 = vsyncadd [#allocation9], 4294967232 }
  0x2b   :  { %2915 = dma.done.wait [#allocation12], 64  }
  0x2c   :  { %2916 = vsyncadd [#allocation12], 4294967232 }
  0x2d   :  { %2917 = dma.done.wait [#allocation15], 32  }
  0x2e   :  { %2918 = vsyncadd [#allocation15], 4294967264  ;;  %v2933_v0 = vmov 1   ;;  %s3784_s0 = sld [smem:[#allocation25_spill]]  ;;  %v3129_v5 = vld [vmem:[#allocation2 + $0x8] sm:$0xff]  ;;  %v3132_v6 = vld [vmem:[#allocation2] sm:$0xff]  ;;  %v211_v7 = vlaneseq }
  0x2f   :  { %2544 = vset.pattern.permute.xlu0 %v2933_v0  ;;  %2545 = vset.pattern.permute.xlu1 %v2933_v0  ;;  %s3785_s5 = sld [smem:[#allocation27_spill]]  ;;  %vm247_vm0 = vcmask 130048   ;;  %v2934_v13 = vmov 0.0   ;;  %v463_v25 = vld [vmem:[%s3750_s9 + $0x18] sm:$0xff]  ;;  %v462_v26 = vld [vmem:[%s3750_s9 + $0x10] sm:$0xff]  ;;  %v461_v28 = vld [vmem:[%s3750_s9 + $0x8] sm:$0xff] }
  0x30   :  { %274 = vmatpush.msra.mxu0 %v3129_v5  ;;  %v3142_v10 = vand.u32 127, %v211_v7  ;;  %s3786_s20 = sld [smem:[#allocation29_spill]]  ;;  %v460_v29 = vld [vmem:[%s3750_s9] sm:$0xff]  ;;  %vm336_vm5 = vcmask 261120   ;;  %s2935_s25 = smov 96   ;;  %v3232_v56 = vshrl.u32 %v211_v7, 7 }
  0x31   :  { %s3787_s29 = sld [smem:[#allocation26_spill]]  ;;  %v2586_v36 = vld [vmem:[%s3751_s10] ss:$0 sm:$0xff]  ;;  %s2936_s11 = smov 88   ;;  %vm512_vm8 = vcmask 64512  }
  0x32   :  { %275 = vmatpush.msra.mxu0 %v3132_v6  ;;  %s3788_s13 = sld [smem:[#allocation28_spill]]  ;;  %s2937_s1 = smov 120  }
  0x33   :  { %s3789_s17 = sld [smem:[#allocation24_spill]]  ;;  %s2938_s16 = smov 64  }
  0x34   :  { %v207_v1 = vld [vmem:[%s3784_s0] sm:$0xff]  ;;  %v209_v2 = vld [vmem:[%s3784_s0 + $0x10] sm:$0xff]  ;;  %v208_v3 = vld [vmem:[%s3784_s0 + $0x8] sm:$0xff]  ;;  %486 = vmatpush.msrb.mxu0 %v463_v25  ;;  %s3790_s28 = sld [smem:[#allocation30_spill]]  ;;  %s2939_s30 = smov 80  }
  0x35   :  { %224 = vperm.xlu0 %2544, %v207_v1   ;;  %230 = vperm.xlu1 %2545, %v209_v2   ;;  %v210_v4 = vld [vmem:[%s3784_s0 + $0x18] sm:$0xff]  ;;  %v291_v9 = vld [vmem:[%s3785_s5 + $0x10] sm:$0xff]  ;;  %v290_v11 = vld [vmem:[%s3785_s5 + $0x8] sm:$0xff]  ;;  %v3245_v2 = vadd.s32 8, %v3232_v56  ;;  %s2940_s26 = smov 72   ;;  %s2942_s7 = smov 56  }
  0x36   :  { %v292_v8 = vld [vmem:[%s3785_s5 + $0x18] sm:$0xff]  ;;  %v289_v21 = vld [vmem:[%s3785_s5] sm:$0xff]  ;;  %v294_v22 = vld [vmem:[%s3786_s20 + $0x8] sm:$0xff]  ;;  %487 = vmatpush.msrb.mxu0 %v462_v26  ;;  %s2943_s2 = smov 104   ;;  %s3774_s18 = smov 40  }
  0x37   :  { %361 = vmatpush.msra.mxu2 %v292_v8  ;;  %v293_v23 = vld [vmem:[%s3786_s20] sm:$0xff]  ;;  %321 = vmatpush.msra.mxu1 %v294_v22  ;;  %v203_v27 = vld [vmem:[%s3787_s29 + $0x8] sm:$0xff]  ;;  %v204_v30 = vld [vmem:[%s3787_s29 + $0x10] sm:$0xff]  ;;  %s3773_s0 = smov 48  }
  0x38   :  { %v202_v24 = vld [vmem:[%s3787_s29] sm:$0xff]  ;;  %488 = vmatpush.msrb.mxu0 %v461_v28  ;;  %v205_v31 = vld [vmem:[%s3787_s29 + $0x18] sm:$0xff] }
  0x39   :  { %362 = vmatpush.msra.mxu2 %v291_v9  ;;  %322 = vmatpush.msra.mxu1 %v293_v23  ;;  %v2587_v49 = vld [vmem:[%s3788_s13] ss:$0 sm:$0xff] }
  0x3a   :  { %2361 = vmatmul.msk.f32.vlgmr.msra.gmra.mxu1 %vm247_vm0, %v202_v24  ;;  %489 = vmatpush.msrb.mxu0 %v460_v29  ;;  %v206_v51 = vld [vmem:[%s3789_s17] sm:$0x3]  ;;  %v423_v7 = vld [vmem:[%s3790_s28 + $0x10] sm:$0xff]  ;;  %v422_v8 = vld [vmem:[%s3790_s28 + $0x8] sm:$0xff]  ;;  %s2941_s17 = smov 112  }
  0x3b   :  { %363 = vmatpush.msra.mxu2 %v290_v11  ;;  %v216_v57 = vperm.slane %v206_v51, 0  ;;  %v421_v9 = vld [vmem:[%s3790_s28] sm:$0xff] }
  0x3d   :  { %227 = vperm.xlu0 %2544, %v208_v3   ;;  %233 = vperm.xlu1 %2545, %v210_v4   ;;  %vm217_vm6 = vcmp.eq.s32.totalorder %v3232_v56, %v216_v57  ;;  %vm218_vm7 = vcmp.eq.s32.totalorder %v3245_v2, %v216_v57  ;;  %v424_v4 = vld [vmem:[%s3790_s28 + $0x18] sm:$0xff] }
  0x3e   :  { %364 = vmatpush.msra.mxu2 %v289_v21  ;;  %v3242_v1 = vsel %vm217_vm6, 1.0, %v2934_v13  ;;  %v3253_v3 = vsel %vm218_vm7, 1.0, %v2934_v13 }
  0x40   :  { %2510 = vmatpush.msrb.mxu2 %v463_v25 }
  0x42   :  { %2511 = vmatpush.msrb.mxu2 %v462_v26  ;;  %2362 = vmatmul.msk.f32.gmra.mxu1 %vm247_vm0, %v203_v27 }
  0x44   :  { %2512 = vmatpush.msrb.mxu2 %v461_v28 }
  0x46   :  { %2513 = vmatpush.msrb.mxu2 %v460_v29 }
  0x4a   :  { %2363 = vmatmul.msk.f32.gmra.mxu1 %vm247_vm0, %v204_v30 }
  0x52   :  { %2364 = vmatmul.msk.f32.gmra.mxu1 %vm247_vm0, %v205_v31 }
  0xa7   :  { %v225_v12 = vpop.permute.xlu0 %224  ;;  %v231_v16 = vpop.permute.xlu1 %230 }
  0xa8   :  { %vm235_vm1 = vcmp.eq.s32.totalorder %v3142_v10, %v225_v12  ;;  %vm237_vm3 = vcmp.eq.s32.totalorder %v3142_v10, %v231_v16 }
  0xa9   :  { %v3149_v14 = vsel %vm235_vm1, 1.0, %v2934_v13  ;;  %v3161_v18 = vsel %vm237_vm3, 1.0, %v2934_v13  ;;  %vm1139_vm1 = vcmask 523264  }
  0xaa   :  { %2357 = vmatmul.msk.f32.vlgmr.msra.gmra.mxu0 %vm247_vm0, %v3149_v14 }
  0xaf   :  { %v228_v15 = vpop.permute.xlu0 %227  ;;  %v234_v19 = vpop.permute.xlu1 %233 }
  0xb0   :  { %vm236_vm2 = vcmp.eq.s32.totalorder %v3142_v10, %v228_v15  ;;  %vm238_vm4 = vcmp.eq.s32.totalorder %v3142_v10, %v234_v19 }
  0xb1   :  { %v3155_v17 = vsel %vm236_vm2, 1.0, %v2934_v13  ;;  %v3167_v20 = vsel %vm238_vm4, 1.0, %v2934_v13 }
  0xb2   :  { %2358 = vmatmul.msk.f32.gmra.mxu0 %vm247_vm0, %v3155_v17 }
  0xb7   :  { %v324_v39 = vpop.f32.mrf.mxu1 }
  0xba   :  { %2359 = vmatmul.msk.f32.gmra.mxu0 %vm247_vm0, %v3161_v18 }
  0xbf   :  { %v327_v41 = vpop.f32.mrf.mxu1 }
  0xc2   :  { %2360 = vmatmul.msk.f32.gmra.mxu0 %vm247_vm0, %v3167_v20 }
  0xc7   :  { %v330_v43 = vpop.f32.mrf.mxu1 }
  0xca   :  { %2373 = vmatmul.msk.f32.vlgmr.msrb.gmra.mxu0 %vm336_vm5, %v3132_v6 }
  0xcf   :  { %v333_v45 = vpop.f32.mrf.mxu1 }
 0x127   :  { %v277_v32 = vpop.f32.mrf.mxu0 }
 0x128   :  { %2365 = vmatmul.msk.f32.vlgmr.msra.gmra.mxu2 %vm336_vm5, %v277_v32 }
 0x12f   :  { %v280_v33 = vpop.f32.mrf.mxu0 }
 0x130   :  { %2366 = vmatmul.msk.f32.gmra.mxu2 %vm336_vm5, %v280_v33 }
 0x137   :  { %v283_v34 = vpop.f32.mrf.mxu0 }
 0x138   :  { %2367 = vmatmul.msk.f32.gmra.mxu2 %vm336_vm5, %v283_v34 }
 0x13f   :  { %v286_v35 = vpop.f32.mrf.mxu0 }
 0x140   :  { %2368 = vmatmul.msk.f32.gmra.mxu2 %vm336_vm5, %v286_v35 }
 0x147   :  { %v491_v37 = vpop.f32.mrf.mxu0 }
 0x148   :  { %2374 = vmatmul.msk.f32.vlgmr.msrb.gmra.mxu2 %vm336_vm5, %v3129_v5  ;;  %v3219_v38 = vadd.f32 %v2586_v36, %v491_v37 }
 0x14a   :  { %508 = vrot.lane.b32.xlu0 %v3219_v38, %s2935_s25  ;;  %638 = vrot.lane.b32.xlu1 %v3219_v38, %s2936_s11 }
 0x1ab   :  { %v366_v40 = vpop.f32.mrf.mxu2 }
 0x1ac   :  { %v367_v54 = vadd.f32 %v366_v40, %v324_v39 }
 0x1ae   :  { %v382_v61 = vadd.f32 %v2587_v49, %v367_v54 }
 0x1b0   :  { %v386_v0 = vmax.f32 %v382_v61, 0.0 }
 0x1b3   :  { %v369_v42 = vpop.f32.mrf.mxu2 }
 0x1b4   :  { %v370_v50 = vadd.f32 %v369_v42, %v327_v41 }
 0x1b6   :  { %v383_v58 = vadd.f32 %v2587_v49, %v370_v50 }
 0x1b8   :  { %v387_v63 = vmax.f32 %v383_v58, 0.0 }
 0x1bb   :  { %v372_v44 = vpop.f32.mrf.mxu2 }
 0x1bc   :  { %v373_v46 = vadd.f32 %v372_v44, %v330_v43  ;;  %v509_v12 = vpop.permute.xlu0 %508  ;;  %v639_v16 = vpop.permute.xlu1 %638 }
 0x1be   :  { %v384_v53 = vadd.f32 %v2587_v49, %v373_v46 }
 0x1c0   :  { %v388_v59 = vmax.f32 %v384_v53, 0.0 }
 0x1c3   :  { %v375_v47 = vpop.f32.mrf.mxu2 }
 0x1c4   :  { %v376_v48 = vadd.f32 %v375_v47, %v333_v45 }
 0x1c6   :  { %v385_v52 = vadd.f32 %v2587_v49, %v376_v48 }
 0x1c8   :  { %v389_v55 = vmax.f32 %v385_v52, 0.0  ;;  %v502_v52 = vld [vmem:[#allocation5] sm:$0xff] }
 0x1ca   :  { %408 = vmatpush.msra.mxu3 %v389_v55 }
 0x1cb   :  { %v494_v60 = vpop.f32.mrf.mxu2 }
 0x1cc   :  { %v3234_v62 = vadd.f32 %v2586_v36, %v494_v60  ;;  %409 = vmatpush.msra.mxu3 %v388_v59 }
 0x1ce   :  { %636 = vrot.lane.b32.xlu0 %v3234_v62, %s2937_s1  ;;  %510 = vrot.lane.b32.xlu2 %v3234_v62, %s2935_s25  ;;  %v3297_v41 = vpack.i.bf16 %v3219_v38, %v3234_v62 }
 0x1cf   :  { %410 = vmatpush.msra.mxu3 %v387_v63 }
 0x1d1   :  { %411 = vmatpush.msra.mxu3 %v386_v0 }
 0x1d2   :  { %2369 = vmatmul.msk.f32.vlgmr.msra.gmra.mxu3 %vm336_vm5, %v3242_v1 }
 0x1d3   :  { %447 = vmatpush.msrb.mxu3 %v424_v4 }
 0x1d5   :  { %448 = vmatpush.msrb.mxu3 %v423_v7 }
 0x1d6   :  { %640 = vrot.lane.b32.xlu2 %v3234_v62, %s2936_s11 }
 0x1d7   :  { %449 = vmatpush.msrb.mxu3 %v422_v8 }
 0x1d9   :  { %450 = vmatpush.msrb.mxu3 %v421_v9 }
 0x1da   :  { %2370 = vmatmul.msk.f32.gmra.mxu3 %vm336_vm5, %v3253_v3 }
 0x1de   :  { %634 = vrot.lane.b32.xlu2 %v3219_v38, %s2937_s1 }
 0x228   :  { %v511_v11 = vpop.permute.xlu2 %510 }
 0x229   :  { %2375 = vmatpush.xpose.msk.msrb.mxu1 %vm512_vm8, %v511_v11  ;;  %2514 = vmatpush.xpose.msk.msra.mxu3 %vm512_vm8, %v511_v11 }
 0x22d   :  { %2376 = vmatpush.xpose.msk.msrb.mxu1 %vm512_vm8, %v509_v12  ;;  %2515 = vmatpush.xpose.msk.msra.mxu3 %vm512_vm8, %v509_v12 }
 0x230   :  { %2377 = vmatmul.msk.f32.vlgmr.msrb.gmra.mxu1 %vm512_vm8, %v3219_v38  ;;  %v641_v15 = vpop.permute.xlu2 %640 }
 0x231   :  { %2383 = vmatpush.xpose.msk.msra.mxu0 %vm512_vm8, %v641_v15 }
 0x235   :  { %2384 = vmatpush.xpose.msk.msra.mxu0 %vm512_vm8, %v639_v16 }
 0x238   :  { %v635_v19 = vpop.permute.xlu2 %634 }
 0x239   :  { %2385 = vmatmul.msk.f32.vlgmr.msra.gmra.mxu0 %vm512_vm8, %v635_v19 }
 0x240   :  { %v637_v21 = vpop.permute.xlu0 %636 }
 0x241   :  { %2386 = vmatmul.msk.f32.gmra.mxu0 %vm512_vm8, %v637_v21 }
 0x255   :  { %v413_v22 = vpop.f32.mrf.mxu3 }
 0x256   :  { %v419_v23 = vadd.f32 %v413_v22, %v3132_v6 }
 0x258   :  { %2371 = vmatmul.msk.f32.vlgmr.msrb.gmra.mxu3 %vm336_vm5, %v419_v23 }
 0x259   :  { %624 = vmatpush.msrb.mxu3 %v502_v52 }
 0x25d   :  { %v416_v24 = vpop.f32.mrf.mxu3 }
 0x25e   :  { %v420_v25 = vadd.f32 %v416_v24, %v3129_v5 }
 0x260   :  { %2372 = vmatmul.msk.f32.gmra.mxu3 %vm336_vm5, %v420_v25 }
 0x268   :  { %2378 = vmatmul.msk.f32.vlgmr.msra.gmra.mxu3 %vm512_vm8, %v3234_v62 }
 0x2ad   :  { %v538_v26 = vpop.f32.mrf.mxu1 }
 0x2ae   :  { %v544_v27 = vmul.f32 0.35355338, %v538_v26  ;;  %v503_v26 = vld [vmem:[#allocation5 + $0x8] sm:$0xff] }
 0x2b0   :  { %v546_v28 = vsel %vm247_vm0, %v544_v27, -inf }
 0x2b1   :  { %547 = vmax.xlane.f32.xlu1 %v546_v28 }
 0x2b6   :  { %v667_v29 = vpop.f32.mrf.mxu0 }
 0x2b7   :  { %v673_v30 = vmul.f32 0.35355338, %v667_v29 }
 0x2b9   :  { %v675_v31 = vsel %vm247_vm0, %v673_v30, -inf }
 0x2ba   :  { %676 = vmax.xlane.f32.xlu2 %v675_v31 }
 0x2be   :  { %v670_v32 = vpop.f32.mrf.mxu0 }
 0x2bf   :  { %v674_v33 = vmul.f32 0.35355338, %v670_v32 }
 0x2c1   :  { %v678_v34 = vsel %vm247_vm0, %v674_v33, -inf }
 0x2c2   :  { %679 = vmax.xlane.f32.xlu2 %v678_v34 }
 0x2db   :  { %v3290_v35 = vpop.f32.mrf.mxu3 }
 0x2e3   :  { %v3292_v36 = vpop.f32.mrf.mxu3 }
 0x2eb   :  { %v541_v37 = vpop.f32.mrf.mxu3 }
 0x2ec   :  { %v545_v39 = vmul.f32 0.35355338, %v541_v37 }
 0x2ee   :  { %v549_v40 = vsel %vm247_vm0, %v545_v39, -inf }
 0x2ef   :  { %550 = vmax.xlane.f32.xlu0 %v549_v40 }
 0x303   :  { %2547 = vrot.lane.b32.xlu0 %v3297_v41, %s2938_s16 }
 0x30b   :  { %769 = vrot.lane.b32.xlu0 %v3234_v62, %s2939_s30 }
 0x313   :  { %896 = vrot.lane.b32.xlu0 %v3219_v38, %s2940_s26 }
 0x31b   :  { %767 = vrot.lane.b32.xlu0 %v3219_v38, %s2939_s30 }
 0x323   :  { %765 = vrot.lane.b32.xlu0 %v3234_v62, %s2941_s17 }
 0x324   :  { %v548_v42 = vpop.xlane.xlu1 %547 }
 0x325   :  { %v552_v43 = vsub.f32 %v544_v27, %v548_v42 }
 0x327   :  { %v554_v44 = vmul.f32 1.442695, %v552_v43 }
 0x329   :  { %2607 = vpow2.f32 %v554_v44 }
 0x32d   :  { %v677_v45 = vpop.xlane.xlu2 %676 }
 0x32e   :  { %v681_v46 = vsub.f32 %v673_v30, %v677_v45  ;;  %v2589_v45 = vld [vmem:[%s3753_s12] ss:$0 sm:$0xff] }
 0x32f   :  { %v2608_v47 = vpop.eup %2607 }
 0x330   :  { %v683_v48 = vmul.f32 1.442695, %v681_v46  ;;  %v558_v49 = vsel %vm247_vm0, %v2608_v47, 0.0 }
 0x331   :  { %559 = vadd.xlane.f32.xlu1 %v558_v49 }
 0x332   :  { %2609 = vpow2.f32 %v683_v48 }
 0x335   :  { %v680_v53 = vpop.xlane.xlu2 %679 }
 0x336   :  { %v682_v57 = vsub.f32 %v674_v33, %v680_v53 }
 0x338   :  { %v2610_v50 = vpop.eup %2609  ;;  %v685_v59 = vmul.f32 1.442695, %v682_v57 }
 0x339   :  { %v687_v51 = vsel %vm247_vm0, %v2610_v50, 0.0 }
 0x33a   :  { %688 = vadd.xlane.f32.xlu2 %v687_v51 }
 0x352   :  { %2552 = vrot.lane.b32.xlu2 %v3297_v41, %s2942_s7 }
 0x35a   :  { %892 = vrot.lane.b32.xlu2 %v3219_v38, %s2943_s2 }
 0x362   :  { %v551_v54 = vpop.xlane.xlu0 %550  ;;  %763 = vrot.lane.b32.xlu2 %v3219_v38, %s2941_s17 }
 0x363   :  { %v553_v55 = vsub.f32 %v545_v39, %v551_v54 }
 0x365   :  { %v556_v58 = vmul.f32 1.442695, %v553_v55 }
 0x367   :  { %2611 = vpow2.f32 %v556_v58 }
 0x368   :  { %2613 = vpow2.f32 %v685_v59 }
 0x36d   :  { %v2612_v60 = vpop.eup %2611 }
 0x36e   :  { %v561_v61 = vsel %vm247_vm0, %v2612_v60, 0.0  ;;  %v2614_v63 = vpop.eup %2613 }
 0x36f   :  { %562 = vadd.xlane.f32.xlu1 %v561_v61  ;;  %v690_v7 = vsel %vm247_vm0, %v2614_v63, 0.0 }
 0x375   :  { %v2548_v0 = vpop.permute.xlu0 %2547 }
 0x376   :  { %v2549_v4 = vunpack.i.l.bf16 %v2548_v0  ;;  %v2550_v8 = vunpack.i.h.bf16 %v2548_v0 }
 0x377   :  { %691 = vadd.xlane.f32.xlu1 %v690_v7 }
 0x378   :  { %594 = vmatpush.msra.mxu2 %v2549_v4 }
 0x37a   :  { %595 = vmatpush.msra.mxu2 %v2550_v8 }
 0x37c   :  { %753 = vmatpush.msrb.mxu2 %v503_v26 }
 0x37d   :  { %v770_v38 = vpop.permute.xlu0 %769 }
 0x37e   :  { %2391 = vmatpush.xpose.msk.msra.mxu3 %vm512_vm8, %v770_v38 }
 0x385   :  { %v897_v9 = vpop.permute.xlu0 %896 }
 0x38d   :  { %v768_v11 = vpop.permute.xlu0 %767 }
 0x38e   :  { %2392 = vmatpush.xpose.msk.msra.mxu3 %vm512_vm8, %v768_v11 }
 0x390   :  { %898 = vrot.lane.b32.xlu1 %v3234_v62, %s2940_s26 }
 0x395   :  { %v766_v43 = vpop.permute.xlu0 %765 }
 0x398   :  { %894 = vrot.lane.b32.xlu1 %v3234_v62, %s2943_s2 }
 0x3a4   :  { %v560_v12 = vpop.xlane.xlu1 %559 }
 0x3a5   :  { %2615 = vrcp.f32 %v560_v12 }
 0x3ab   :  { %v2616_v15 = vpop.eup %2615 }
 0x3ac   :  { %v566_v16 = vmul.f32 %v2616_v15, %v2608_v47 }
 0x3ad   :  { %v689_v19 = vpop.xlane.xlu2 %688 }
 0x3ae   :  { %2379 = vmatmul.msk.f32.vlgmr.msra.gmra.mxu2 %vm247_vm0, %v566_v16  ;;  %2617 = vrcp.f32 %v689_v19 }
 0x3b4   :  { %v2618_v22 = vpop.eup %2617 }
 0x3b5   :  { %v2553_v21 = vpop.permute.xlu2 %2552  ;;  %v695_v25 = vmul.f32 %v2618_v22, %v2610_v50 }
 0x3b6   :  { %v2554_v23 = vunpack.i.l.bf16 %v2553_v21  ;;  %v2555_v24 = vunpack.i.h.bf16 %v2553_v21 }
 0x3b8   :  { %723 = vmatpush.msra.mxu1 %v2554_v23 }
 0x3ba   :  { %724 = vmatpush.msra.mxu1 %v2555_v24 }
 0x3bb   :  { %2387 = vmatmul.msk.f32.vlgmr.msra.gmra.mxu1 %vm247_vm0, %v695_v25 }
 0x3bd   :  { %v893_v37 = vpop.permute.xlu2 %892 }
 0x3c5   :  { %v764_v42 = vpop.permute.xlu2 %763 }
 0x3e2   :  { %v563_v27 = vpop.xlane.xlu1 %562 }
 0x3e3   :  { %2619 = vrcp.f32 %v563_v27 }
 0x3e9   :  { %v2620_v62 = vpop.eup %2619 }
 0x3ea   :  { %v692_v28 = vpop.xlane.xlu1 %691  ;;  %v567_v29 = vmul.f32 %v2620_v62, %v2612_v60 }
 0x3eb   :  { %2621 = vrcp.f32 %v692_v28 }
 0x3ec   :  { %2380 = vmatmul.msk.f32.gmra.mxu2 %vm247_vm0, %v567_v29 }
 0x3f1   :  { %v2622_v30 = vpop.eup %2621 }
 0x3f2   :  { %v696_v31 = vmul.f32 %v2622_v30, %v2614_v63 }
 0x3f4   :  { %2388 = vmatmul.msk.f32.gmra.mxu1 %vm247_vm0, %v696_v31 }
 0x402   :  { %v899_v32 = vpop.permute.xlu1 %898 }
 0x403   :  { %2399 = vmatpush.xpose.msk.msra.mxu2 %vm512_vm8, %v899_v32 }
 0x407   :  { %2400 = vmatpush.xpose.msk.msra.mxu2 %vm512_vm8, %v897_v9 }
 0x40a   :  { %v895_v44 = vpop.permute.xlu1 %894 }
 0x431   :  { %v597_v33 = vpop.f32.mrf.mxu2 }
 0x432   :  { %2381 = vmatmul.msk.f32.vlgmr.msrb.gmra.mxu3 %vm512_vm8, %v597_v33 }
 0x438   :  { %v726_v34 = vpop.f32.mrf.mxu1 }
 0x439   :  { %2389 = vmatmul.msk.f32.vlgmr.msrb.gmra.mxu2 %vm512_vm8, %v726_v34 }
 0x46f   :  { %v600_v39 = vpop.f32.mrf.mxu2 }
 0x470   :  { %2382 = vmatmul.msk.f32.gmra.mxu3 %vm512_vm8, %v600_v39 }
 0x471   :  { %v729_v40 = vpop.f32.mrf.mxu1 }
 0x472   :  { %2390 = vmatmul.msk.f32.gmra.mxu2 %vm512_vm8, %v729_v40 }
 0x478   :  { %2393 = vmatmul.msk.f32.vlgmr.msra.gmra.mxu3 %vm512_vm8, %v764_v42 }
 0x47a   :  { %2401 = vmatmul.msk.f32.vlgmr.msra.gmra.mxu2 %vm512_vm8, %v893_v37 }
 0x480   :  { %2394 = vmatmul.msk.f32.gmra.mxu3 %vm512_vm8, %v766_v43 }
 0x482   :  { %2402 = vmatmul.msk.f32.gmra.mxu2 %vm512_vm8, %v895_v44 }
 0x4b5   :  { %v626_v46 = vpop.f32.mrf.mxu3 }
 0x4b6   :  { %v632_v47 = vadd.f32 %v2589_v45, %v626_v46 }
 0x4bc   :  { %v755_v48 = vpop.f32.mrf.mxu2 }
 0x4bd   :  { %v3342_v49 = vadd.f32 %v755_v48, %v632_v47 }
 0x4f3   :  { %v629_v50 = vpop.f32.mrf.mxu3 }
 0x4f4   :  { %v633_v51 = vadd.f32 %v2589_v45, %v629_v50 }
 0x4f5   :  { %v758_v52 = vpop.f32.mrf.mxu2 }
 0x4f6   :  { %v3344_v53 = vadd.f32 %v758_v52, %v633_v51 }
 0x4fb   :  { %v796_v54 = vpop.f32.mrf.mxu3 }
 0x4fc   :  { %v802_v55 = vmul.f32 0.35355338, %v796_v54 }
 0x4fd   :  { %v925_v57 = vpop.f32.mrf.mxu2 }
 0x4fe   :  { %v931_v58 = vmul.f32 0.35355338, %v925_v57  ;;  %v804_v59 = vsel %vm247_vm0, %v802_v55, -inf  ;;  %v505_v57 = vld [vmem:[#allocation5 + $0x18] sm:$0xff] }
 0x4ff   :  { %805 = vmax.xlane.f32.xlu1 %v804_v59 }
 0x500   :  { %v933_v60 = vsel %vm247_vm0, %v931_v58, -inf }
 0x501   :  { %934 = vmax.xlane.f32.xlu2 %v933_v60 }
 0x503   :  { %v799_v61 = vpop.f32.mrf.mxu3 }
 0x504   :  { %v803_v63 = vmul.f32 0.35355338, %v799_v61 }
 0x505   :  { %v928_v0 = vpop.f32.mrf.mxu2 }
 0x506   :  { %v932_v4 = vmul.f32 0.35355338, %v928_v0  ;;  %v807_v8 = vsel %vm247_vm0, %v803_v63, -inf  ;;  %v2588_v0 = vld [vmem:[%s3749_s8] ss:$0 sm:$0xff] }
 0x508   :  { %v936_v7 = vsel %vm247_vm0, %v932_v4, -inf }
 0x509   :  { %937 = vmax.xlane.f32.xlu0 %v936_v7  ;;  %808 = vmax.xlane.f32.xlu2 %v807_v8 }
 0x521   :  { %2557 = vrot.lane.b32.xlu2 %v3297_v41, %s3774_s18 }
 0x572   :  { %v806_v38 = vpop.xlane.xlu1 %805 }
 0x573   :  { %v810_v9 = vsub.f32 %v802_v55, %v806_v38 }
 0x574   :  { %v935_v11 = vpop.xlane.xlu2 %934 }
 0x575   :  { %v812_v12 = vmul.f32 1.442695, %v810_v9  ;;  %v939_v15 = vsub.f32 %v931_v58, %v935_v11  ;;  %v504_v58 = vld [vmem:[#allocation5 + $0x10] sm:$0xff] }
 0x576   :  { %882 = vmatpush.msrb.mxu1 %v504_v58 }
 0x577   :  { %2623 = vpow2.f32 %v812_v12  ;;  %v941_v16 = vmul.f32 1.442695, %v939_v15  ;;  %v456_v12 = vadd.f32 %v2588_v0, %v3292_v36 }
 0x579   :  { %2625 = vpow2.f32 %v941_v16 }
 0x57c   :  { %v938_v19 = vpop.xlane.xlu0 %937  ;;  %v809_v21 = vpop.xlane.xlu2 %808 }
 0x57d   :  { %v2624_v22 = vpop.eup %2623  ;;  %v940_v23 = vsub.f32 %v932_v4, %v938_v19  ;;  %v811_v27 = vsub.f32 %v803_v63, %v809_v21  ;;  %v453_v4 = vadd.f32 %v2588_v0, %v3290_v35  ;;  %v459_v19 = vmax.f32 %v456_v12, 0.0 }
 0x57e   :  { %v816_v24 = vsel %vm247_vm0, %v2624_v22, 0.0 }
 0x57f   :  { %v2626_v25 = vpop.eup %2625  ;;  %v943_v26 = vmul.f32 1.442695, %v940_v23  ;;  %817 = vadd.xlane.f32.xlu0 %v816_v24  ;;  %v814_v28 = vmul.f32 1.442695, %v811_v27  ;;  %v458_v7 = vmax.f32 %v453_v4, 0.0  ;;  %v1022_v35 = vadd.f32 %v459_v19, %v3129_v5 }
 0x580   :  { %v945_v62 = vsel %vm247_vm0, %v2626_v25, 0.0 }
 0x581   :  { %2627 = vpow2.f32 %v943_v26  ;;  %946 = vadd.xlane.f32.xlu1 %v945_v62  ;;  %v1021_v11 = vadd.f32 %v458_v7, %v3132_v6  ;;  %v2946_v6 = vmov 32.0  }
 0x582   :  { %2629 = vpow2.f32 %v814_v28 }
 0x584   :  { %v2558_v29 = vpop.permute.xlu2 %2557 }
 0x585   :  { %v2559_v30 = vunpack.i.l.bf16 %v2558_v29  ;;  %v2560_v32 = vunpack.i.h.bf16 %v2558_v29 }
 0x587   :  { %v2628_v31 = vpop.eup %2627  ;;  %981 = vmatpush.msrb.mxu3 %v2559_v30 }
 0x588   :  { %v948_v33 = vsel %vm247_vm0, %v2628_v31, 0.0  ;;  %v2630_v34 = vpop.eup %2629 }
 0x589   :  { %949 = vadd.xlane.f32.xlu1 %v948_v33  ;;  %982 = vmatpush.msrb.mxu3 %v2560_v32  ;;  %v819_v37 = vsel %vm247_vm0, %v2630_v34, 0.0 }
 0x591   :  { %820 = vadd.xlane.f32.xlu1 %v819_v37 }
 0x593   :  { %2562 = vrot.lane.b32.xlu0 %v3297_v41, %s3773_s0 }
 0x5f2   :  { %v818_v44 = vpop.xlane.xlu0 %817 }
 0x5f4   :  { %v947_v39 = vpop.xlane.xlu1 %946 }
 0x5f5   :  { %2631 = vrcp.f32 %v947_v39 }
 0x5fb   :  { %v2632_v40 = vpop.eup %2631 }
 0x5fc   :  { %v953_v42 = vmul.f32 %v2632_v40, %v2626_v25  ;;  %v950_v43 = vpop.xlane.xlu1 %949 }
 0x5fd   :  { %2633 = vrcp.f32 %v950_v43  ;;  %v1091_v43 = vld [vmem:[#allocation7 + $0x18] sm:$0xff] }
 0x5fe   :  { %2403 = vmatmul.msk.f32.vlgmr.msrb.gmra.mxu3 %vm247_vm0, %v953_v42  ;;  %2635 = vrcp.f32 %v818_v44  ;;  %1114 = vmatpush.msra.mxu1 %v1091_v43  ;;  %v1090_v44 = vld [vmem:[#allocation7 + $0x10] sm:$0xff] }
 0x600   :  { %1115 = vmatpush.msra.mxu1 %v1090_v44 }
 0x603   :  { %v2634_v45 = vpop.eup %2633 }
 0x604   :  { %v954_v46 = vmul.f32 %v2634_v45, %v2628_v31  ;;  %v821_v47 = vpop.xlane.xlu1 %820  ;;  %v2636_v50 = vpop.eup %2635  ;;  %v1089_v45 = vld [vmem:[#allocation7 + $0x8] sm:$0xff] }
 0x605   :  { %v2563_v48 = vpop.permute.xlu0 %2562  ;;  %2637 = vrcp.f32 %v821_v47  ;;  %v824_v52 = vmul.f32 %v2636_v50, %v2624_v22  ;;  %1116 = vmatpush.msra.mxu1 %v1089_v45 }
 0x606   :  { %v2564_v51 = vunpack.i.l.bf16 %v2563_v48  ;;  %2404 = vmatmul.msk.f32.gmra.mxu3 %vm247_vm0, %v954_v46  ;;  %v2565_v41 = vunpack.i.h.bf16 %v2563_v48  ;;  %2639 = vrcp.f32 %v2946_v6  ;;  %v1088_v46 = vld [vmem:[#allocation7] sm:$0xff] }
 0x607   :  { %1117 = vmatpush.msra.mxu1 %v1088_v46  ;;  %v1129_v6 = vld [vmem:[%s3756_s15 + $0x10] sm:$0xff] }
 0x608   :  { %852 = vmatpush.msrb.mxu0 %v2564_v51  ;;  %v1134_v51 = vld [vmem:[%s3756_s15 + $0x38] sm:$0xff] }
 0x609   :  { %1154 = vmatpush.msrb.mxu2 %v1134_v51 }
 0x60a   :  { %853 = vmatpush.msrb.mxu0 %v2565_v41  ;;  %v1133_v41 = vld [vmem:[%s3756_s15 + $0x30] sm:$0xff] }
 0x60b   :  { %2395 = vmatmul.msk.f32.vlgmr.msrb.gmra.mxu0 %vm247_vm0, %v824_v52  ;;  %v2638_v54 = vpop.eup %2637  ;;  %v1132_v52 = vld [vmem:[%s3756_s15 + $0x28] sm:$0xff]  ;;  %1155 = vmatpush.msrb.mxu2 %v1133_v41 }
 0x60c   :  { %v825_v55 = vmul.f32 %v2638_v54, %v2630_v34  ;;  %1011 = vmatpush.msra.mxu0 %v505_v57  ;;  %v2640_v36 = vpop.eup %2639  ;;  %v1131_v57 = vld [vmem:[%s3756_s15 + $0x20] sm:$0xff] }
 0x60d   :  { %v1034_v27 = vmul.f32 32.0, %v2640_v36  ;;  %vm1038_vm9 = vweird.f32 %v2640_v36  ;;  %1156 = vmatpush.msrb.mxu2 %v1132_v52 }
 0x60f   :  { %v1035_v62 = vsub.f32 1.0, %v1034_v27  ;;  %1157 = vmatpush.msrb.mxu2 %v1131_v57  ;;  %v1127_v27 = vld [vmem:[%s3756_s15] sm:$0xff] }
 0x611   :  { %v1036_v28 = vmul.f32 %v2640_v36, %v1035_v62  ;;  %v2592_v62 = vld [vmem:[%s3755_s14] ss:$0 sm:$0xff] }
 0x613   :  { %2396 = vmatmul.msk.f32.gmra.mxu0 %vm247_vm0, %v825_v55  ;;  %v1037_v29 = vadd.f32 %v2640_v36, %v1036_v28 }
 0x615   :  { %v3377_v30 = vsel %vm1038_vm9, %v2640_v36, %v1037_v29  ;;  %v1128_v36 = vld [vmem:[%s3756_s15 + $0x8] sm:$0xff] }
 0x681   :  { %v984_v59 = vpop.f32.mrf.mxu3 }
 0x682   :  { %2405 = vmatmul.msk.f32.vlgmr.msra.gmra.mxu0 %vm512_vm8, %v984_v59 }
 0x688   :  { %v855_v60 = vpop.f32.mrf.mxu0 }
 0x689   :  { %2397 = vmatmul.msk.f32.vlgmr.msrb.gmra.mxu1 %vm512_vm8, %v855_v60  ;;  %v987_v61 = vpop.f32.mrf.mxu3  ;;  %v1130_v60 = vld [vmem:[%s3756_s15 + $0x18] sm:$0xff] }
 0x68a   :  { %2406 = vmatmul.msk.f32.gmra.mxu0 %vm512_vm8, %v987_v61  ;;  %1158 = vmatpush.msrb.mxu2 %v1130_v60  ;;  %v3431_v60 = vld [vmem:[%s3762_s21 + $0x10] sm:$0xff] }
 0x68c   :  { %1159 = vmatpush.msrb.mxu2 %v1129_v6 }
 0x68e   :  { %1160 = vmatpush.msrb.mxu2 %v1128_v36 }
 0x690   :  { %v858_v63 = vpop.f32.mrf.mxu0  ;;  %1161 = vmatpush.msrb.mxu2 %v1127_v27 }
 0x691   :  { %2398 = vmatmul.msk.f32.gmra.mxu1 %vm512_vm8, %v858_v63 }
 0x6ff   :  { %v1013_v8 = vpop.f32.mrf.mxu0 }
 0x706   :  { %v884_v38 = vpop.f32.mrf.mxu1 }
 0x707   :  { %v890_v9 = vadd.f32 %v884_v38, %v3342_v49  ;;  %v1016_v24 = vpop.f32.mrf.mxu0 }
 0x709   :  { %v1019_v15 = vadd.f32 %v1013_v8, %v890_v9  ;;  %v2590_v9 = vld [vmem:[#allocation10] ss:$0 sm:$0xff] }
 0x70b   :  { %v1023_v16 = vadd.f32 %v1021_v11, %v1019_v15 }
 0x70d   :  { %v1027_v21 = vsel %vm336_vm5, %v1023_v16, 0.0 }
 0x70e   :  { %v887_v22 = vpop.f32.mrf.mxu1  ;;  %1028 = vadd.xlane.f32.xlu1 %v1027_v21 }
 0x70f   :  { %v891_v23 = vadd.f32 %v887_v22, %v3344_v53 }
 0x711   :  { %v1020_v25 = vadd.f32 %v1016_v24, %v891_v23 }
 0x713   :  { %v1024_v26 = vadd.f32 %v1022_v35, %v1020_v25 }
 0x715   :  { %v1030_v49 = vsel %vm336_vm5, %v1024_v26, 0.0 }
 0x716   :  { %1031 = vadd.xlane.f32.xlu2 %v1030_v49 }
 0x781   :  { %v1029_v31 = vpop.xlane.xlu1 %1028 }
 0x782   :  { %v1040_v53 = vmul.f32 %v3377_v30, %v1029_v31 }
 0x784   :  { %v1042_v32 = vsub.f32 %v1023_v16, %v1040_v53  ;;  %v2591_v16 = vld [vmem:[#allocation11] ss:$0 sm:$0xff] }
 0x786   :  { %v1044_v5 = vmul.f32 %v1042_v32, %v1042_v32 }
 0x788   :  { %v1046_v33 = vsel %vm336_vm5, %v1044_v5, 0.0 }
 0x789   :  { %1047 = vadd.xlane.f32.xlu0 %v1046_v33  ;;  %v1032_v34 = vpop.xlane.xlu2 %1031 }
 0x78a   :  { %v1041_v37 = vmul.f32 %v3377_v30, %v1032_v34  ;;  %v2593_v34 = vld [vmem:[#allocation8] ss:$0 sm:$0xff] }
 0x78c   :  { %v1043_v39 = vsub.f32 %v1024_v26, %v1041_v37 }
 0x78e   :  { %v1045_v40 = vmul.f32 %v1043_v39, %v1043_v39 }
 0x790   :  { %v1049_v42 = vsel %vm336_vm5, %v1045_v40, 0.0 }
 0x791   :  { %1050 = vadd.xlane.f32.xlu1 %v1049_v42 }
 0x7fc   :  { %v1048_v47 = vpop.xlane.xlu0 %1047 }
 0x7fd   :  { %v1052_v48 = vmul.f32 %v1048_v47, %v3377_v30 }
 0x7ff   :  { %v1054_v50 = vadd.f32 1e-05, %v1052_v48 }
 0x801   :  { %2641 = vrsqrt.f32 %v1054_v50  ;;  %vm1062_vm11 = vweird.f32 %v1054_v50 }
 0x804   :  { %v1051_v54 = vpop.xlane.xlu1 %1050 }
 0x805   :  { %v1053_v55 = vmul.f32 %v1051_v54, %v3377_v30 }
 0x807   :  { %v2642_v58 = vpop.eup %2641  ;;  %v1055_v59 = vadd.f32 1e-05, %v1053_v55 }
 0x808   :  { %v1057_v61 = vmul.f32 %v2642_v58, %v1054_v50  ;;  %vm1063_vm10 = vweird.f32 %v2642_v58 }
 0x809   :  { %2643 = vrsqrt.f32 %v1055_v59  ;;  %vm1064_vm12 = vmor %vm1062_vm11, %vm1063_vm10  ;;  %vm1072_vm14 = vweird.f32 %v1055_v59 }
 0x80a   :  { %v1058_v63 = vmul.f32 %v2642_v58, %v1057_v61 }
 0x80c   :  { %v1059_v0 = vmul.f32 0.5, %v1058_v63  ;;  %v3438_v63 = vld [vmem:[%s3762_s21 + $0x8] sm:$0xff] }
 0x80e   :  { %v1060_v4 = vsub.f32 1.5, %v1059_v0  ;;  %v3443_v0 = vld [vmem:[%s3762_s21] sm:$0xff] }
 0x80f   :  { %v2644_v7 = vpop.eup %2643 }
 0x810   :  { %v1061_v8 = vmul.f32 %v2642_v58, %v1060_v4  ;;  %v1067_v38 = vmul.f32 %v2644_v7, %v1055_v59  ;;  %vm1073_vm13 = vweird.f32 %v2644_v7 }
 0x811   :  { %vm1074_vm15 = vmor %vm1072_vm14, %vm1073_vm13 }
 0x812   :  { %v1065_v11 = vsel %vm1064_vm12, %v2642_v58, %v1061_v8  ;;  %v1068_v12 = vmul.f32 %v2644_v7, %v1067_v38  ;;  %v3425_v58 = vld [vmem:[%s3762_s21 + $0x18] sm:$0xff]  ;;  %s2948_s21 = smov [#allocation16]  }
 0x813   :  { %v1076_v15 = vmul.f32 %v1065_v11, %v1042_v32  ;;  %1253 = vmatpush.msra.mxu3 %v3425_v58 }
 0x814   :  { %v1069_v19 = vmul.f32 0.5, %v1068_v12 }
 0x815   :  { %v1081_v21 = vmul.f32 %v2590_v9, %v1076_v15  ;;  %1254 = vmatpush.msra.mxu3 %v3431_v60 }
 0x816   :  { %v1070_v22 = vsub.f32 1.5, %v1069_v19 }
 0x817   :  { %v1086_v23 = vadd.f32 %v2591_v16, %v1081_v21  ;;  %1255 = vmatpush.msra.mxu3 %v3438_v63 }
 0x818   :  { %v1071_v24 = vmul.f32 %v2644_v7, %v1070_v22 }
 0x819   :  { %2407 = vmatmul.msk.f32.vlgmr.msra.gmra.mxu1 %vm336_vm5, %v1086_v23  ;;  %1256 = vmatpush.msra.mxu3 %v3443_v0 }
 0x81a   :  { %v1075_v35 = vsel %vm1074_vm15, %v2644_v7, %v1071_v24 }
 0x81b   :  { %v1077_v25 = vmul.f32 %v1075_v35, %v1043_v39 }
 0x81d   :  { %v1082_v26 = vmul.f32 %v2590_v9, %v1077_v25 }
 0x81f   :  { %v1087_v49 = vadd.f32 %v2591_v16, %v1082_v26  ;;  %v2595_v26 = vld [vmem:[#allocation14] ss:$0 sm:$0xff] }
 0x821   :  { %2408 = vmatmul.msk.f32.gmra.mxu1 %vm336_vm5, %v1087_v49 }
 0x896   :  { %v1119_v28 = vpop.f32.mrf.mxu1 }
 0x897   :  { %v1120_v29 = vadd.f32 %v2592_v62, %v1119_v28 }
 0x899   :  { %v1125_v31 = vmax.f32 %v1120_v29, 0.0 }
 0x89b   :  { %2409 = vmatmul.msk.f32.vlgmr.msrb.gmra.mxu2 %vm1139_vm1, %v1125_v31 }
 0x89e   :  { %v1122_v53 = vpop.f32.mrf.mxu1 }
 0x89f   :  { %v1123_v32 = vadd.f32 %v2592_v62, %v1122_v53 }
 0x8a1   :  { %v1126_v5 = vmax.f32 %v1123_v32, 0.0  ;;  %v2444_v32 = vld [vmem:[%s3750_s9 + $0x38] sm:$0xff] }
 0x8a3   :  { %2410 = vmatmul.msk.f32.gmra.mxu2 %vm1139_vm1, %v1126_v5  ;;  %v2443_v5 = vld [vmem:[%s3750_s9 + $0x30] sm:$0xff] }
 0x91e   :  { %v1163_v33 = vpop.f32.mrf.mxu2 }
 0x91f   :  { %v1164_v42 = vadd.f32 %v2593_v34, %v1163_v33  ;;  %v2442_v33 = vld [vmem:[%s3750_s9 + $0x28] sm:$0xff] }
 0x921   :  { %v1169_v44 = vadd.f32 %v1164_v42, %v1086_v23  ;;  %v2594_v23 = vld [vmem:[#allocation13] ss:$0 sm:$0xff]  ;;  %v2690_v42 = vld [vmem:[%s3787_s29 + $0x8] sm:$0xff] }
 0x923   :  { %v1173_v45 = vsel %vm336_vm5, %v1169_v44, 0.0 }
 0x926   :  { %v1166_v37 = vpop.f32.mrf.mxu2 }
 0x927   :  { %v1167_v39 = vadd.f32 %v2593_v34, %v1166_v37  ;;  %v2441_v34 = vld [vmem:[%s3750_s9 + $0x20] sm:$0xff]  ;;  %v2419_v37 = vld [vmem:[%s3785_s5 + $0x30] sm:$0xff] }
 0x929   :  { %v1170_v40 = vadd.f32 %v1167_v39, %v1087_v49  ;;  %v2418_v39 = vld [vmem:[%s3785_s5 + $0x28] sm:$0xff] }
 0x92b   :  { %v1176_v43 = vsel %vm336_vm5, %v1170_v40, 0.0 }
 0x92c   :  { %1177 = vadd.xlane.f32.xlu1 %v1176_v43  ;;  %v2691_v43 = vld [vmem:[%s3787_s29 + $0x10] sm:$0xff] }
 0x934   :  { %1174 = vadd.xlane.f32.xlu1 %v1173_v45  ;;  %v2692_v45 = vld [vmem:[%s3787_s29 + $0x18] sm:$0xff] }
 0x99f   :  { %v1178_v46 = vpop.xlane.xlu1 %1177 }
 0x9a0   :  { %v1180_v47 = vmul.f32 %v1178_v46, %v3377_v30 }
 0x9a2   :  { %v1182_v48 = vsub.f32 %v1170_v40, %v1180_v47  ;;  %v2422_v40 = vld [vmem:[%s3786_s20 + $0x18] sm:$0xff] }
 0x9a3   :  { %1315 = vmatpush.msrb.mxu1 %v2422_v40 }
 0x9a4   :  { %v1184_v50 = vmul.f32 %v1182_v48, %v1182_v48 }
 0x9a6   :  { %v1188_v51 = vsel %vm336_vm5, %v1184_v50, 0.0  ;;  %v2597_v50 = vld [vmem:[%s3751_s10 + $0x1] ss:$0 sm:$0xff] }
 0x9a7   :  { %1189 = vadd.xlane.f32.xlu1 %v1188_v51  ;;  %v1175_v41 = vpop.xlane.xlu1 %1174 }
 0x9a8   :  { %v1179_v52 = vmul.f32 %v1175_v41, %v3377_v30 }
 0x9aa   :  { %v1181_v54 = vsub.f32 %v1169_v44, %v1179_v52 }
 0x9ac   :  { %v1183_v55 = vmul.f32 %v1181_v54, %v1181_v54 }
 0x9ae   :  { %v1185_v57 = vsel %vm336_vm5, %v1183_v55, 0.0 }
 0x9af   :  { %1186 = vadd.xlane.f32.xlu1 %v1185_v57 }
 0xa1a   :  { %v1190_v59 = vpop.xlane.xlu1 %1189 }
 0xa1b   :  { %v1192_v61 = vmul.f32 %v1190_v59, %v3377_v30 }
 0xa1d   :  { %v1194_v4 = vadd.f32 1e-05, %v1192_v61 }
 0xa1f   :  { %2645 = vrsqrt.f32 %v1194_v4  ;;  %vm1211_vm3 = vweird.f32 %v1194_v4 }
 0xa22   :  { %v1187_v7 = vpop.xlane.xlu1 %1186 }
 0xa23   :  { %v1191_v8 = vmul.f32 %v1187_v7, %v3377_v30 }
 0xa25   :  { %v2646_v38 = vpop.eup %2645  ;;  %v1193_v9 = vadd.f32 1e-05, %v1191_v8 }
 0xa26   :  { %v1206_v11 = vmul.f32 %v2646_v38, %v1194_v4  ;;  %vm1212_vm2 = vweird.f32 %v2646_v38 }
 0xa27   :  { %2647 = vrsqrt.f32 %v1193_v9  ;;  %vm1213_vm4 = vmor %vm1211_vm3, %vm1212_vm2  ;;  %vm1201_vm7 = vweird.f32 %v1193_v9 }
 0xa28   :  { %v1207_v12 = vmul.f32 %v2646_v38, %v1206_v11 }
 0xa2a   :  { %v1208_v15 = vmul.f32 0.5, %v1207_v12 }
 0xa2c   :  { %v1209_v16 = vsub.f32 1.5, %v1208_v15  ;;  %v2598_v15 = vld [vmem:[%s3788_s13 + $0x1] ss:$0 sm:$0xff] }
 0xa2d   :  { %v2648_v19 = vpop.eup %2647 }
 0xa2e   :  { %v1210_v21 = vmul.f32 %v2646_v38, %v1209_v16  ;;  %v1196_v22 = vmul.f32 %v2648_v19, %v1193_v9  ;;  %vm1202_vm6 = vweird.f32 %v2648_v19 }
 0xa2f   :  { %vm1203_vm9 = vmor %vm1201_vm7, %vm1202_vm6 }
 0xa30   :  { %v1214_v24 = vsel %vm1213_vm4, %v2646_v38, %v1210_v21  ;;  %v1197_v35 = vmul.f32 %v2648_v19, %v1196_v22 }
 0xa31   :  { %v1216_v25 = vmul.f32 %v1214_v24, %v1182_v48 }
 0xa32   :  { %v1198_v49 = vmul.f32 0.5, %v1197_v35 }
 0xa33   :  { %v1221_v6 = vmul.f32 %v2594_v23, %v1216_v25 }
 0xa34   :  { %v1199_v36 = vsub.f32 1.5, %v1198_v49 }
 0xa35   :  { %v3448_v27 = vadd.f32 %v2595_v26, %v1221_v6 }
 0xa36   :  { %v1200_v62 = vmul.f32 %v2648_v19, %v1199_v36 }
 0xa37   :  { %1278 = vmatpush.msrb.mxu0 %v3448_v27 }
 0xa38   :  { %v1204_v28 = vsel %vm1203_vm9, %v2648_v19, %v1200_v62 }
 0xa39   :  { %v1215_v29 = vmul.f32 %v1204_v28, %v1181_v54 }
 0xa3b   :  { %v1220_v31 = vmul.f32 %v2594_v23, %v1215_v29 }
 0xa3d   :  { %v3451_v53 = vadd.f32 %v2595_v26, %v1220_v31  ;;  %v2437_v31 = vld [vmem:[%s3790_s28 + $0x38] sm:$0xff] }
 0xa3f   :  { %2411 = vmatmul.msk.f32.vlgmr.msra.gmra.mxu3 %vm336_vm5, %v3451_v53  ;;  %1279 = vmatpush.msrb.mxu0 %v3451_v53 }
 0xa40   :  { %2413 = vmatmul.msk.f32.vlgmr.msrb.gmra.mxu0 %vm247_vm0, %v3149_v14  ;;  %v2420_v14 = vld [vmem:[%s3785_s5 + $0x38] sm:$0xff] }
 0xa41   :  { %1472 = vmatpush.msra.mxu0 %v2444_v32  ;;  %1354 = vmatpush.msra.mxu2 %v2420_v14  ;;  %v2436_v32 = vld [vmem:[%s3790_s28 + $0x30] sm:$0xff] }
 0xa43   :  { %1473 = vmatpush.msra.mxu0 %v2443_v5  ;;  %1355 = vmatpush.msra.mxu2 %v2419_v37  ;;  %v2434_v5 = vld [vmem:[%s3790_s28 + $0x20] sm:$0xff] }
 0xa45   :  { %1474 = vmatpush.msra.mxu0 %v2442_v33  ;;  %1356 = vmatpush.msra.mxu2 %v2418_v39 }
 0xa47   :  { %2412 = vmatmul.msk.f32.gmra.mxu3 %vm336_vm5, %v3448_v27  ;;  %1475 = vmatpush.msra.mxu0 %v2441_v34 }
 0xa48   :  { %2414 = vmatmul.msk.f32.gmra.mxu0 %vm247_vm0, %v3155_v17  ;;  %v2417_v17 = vld [vmem:[%s3785_s5 + $0x20] sm:$0xff] }
 0xa49   :  { %1357 = vmatpush.msra.mxu2 %v2417_v17 }
 0xa50   :  { %2415 = vmatmul.msk.f32.gmra.mxu0 %vm247_vm0, %v3161_v18  ;;  %v2421_v18 = vld [vmem:[%s3786_s20 + $0x10] sm:$0xff] }
 0xa51   :  { %1316 = vmatpush.msrb.mxu1 %v2421_v18 }
 0xa58   :  { %2416 = vmatmul.msk.f32.gmra.mxu0 %vm247_vm0, %v3167_v20  ;;  %v2689_v20 = vld [vmem:[%s3787_s29] sm:$0xff] }
 0xa59   :  { %2423 = vmatmul.msk.f32.vlgmr.msrb.gmra.mxu1 %vm247_vm0, %v2689_v20 }
 0xa60   :  { %2446 = vmatmul.msk.f32.vlgmr.msra.gmra.mxu0 %vm336_vm5, %v3451_v53 }
 0xa61   :  { %2424 = vmatmul.msk.f32.gmra.mxu1 %vm247_vm0, %v2690_v42 }
 0xa68   :  { %2447 = vmatmul.msk.f32.gmra.mxu0 %vm336_vm5, %v3448_v27 }
 0xa69   :  { %2425 = vmatmul.msk.f32.gmra.mxu1 %vm247_vm0, %v2691_v43 }
 0xa71   :  { %2426 = vmatmul.msk.f32.gmra.mxu1 %vm247_vm0, %v2692_v45 }
 0xabd   :  { %v1281_v44 = vpop.f32.mrf.mxu0 }
 0xabe   :  { %2427 = vmatmul.msk.f32.vlgmr.msra.gmra.mxu2 %vm336_vm5, %v1281_v44 }
 0xac2   :  { %v3569_v14 = vpop.f32.mrf.mxu3 }
 0xac5   :  { %v1284_v46 = vpop.f32.mrf.mxu0 }
 0xac6   :  { %2428 = vmatmul.msk.f32.gmra.mxu2 %vm336_vm5, %v1284_v46 }
 0xaca   :  { %v3572_v20 = vpop.f32.mrf.mxu3 }
 0xacd   :  { %v1287_v47 = vpop.f32.mrf.mxu0 }
 0xace   :  { %2429 = vmatmul.msk.f32.gmra.mxu2 %vm336_vm5, %v1287_v47 }
 0xad5   :  { %v1290_v48 = vpop.f32.mrf.mxu0 }
 0xad6   :  { %2430 = vmatmul.msk.f32.gmra.mxu2 %vm336_vm5, %v1290_v48  ;;  %v1318_v55 = vpop.f32.mrf.mxu1 }
 0xadd   :  { %v1477_v51 = vpop.f32.mrf.mxu0 }
 0xade   :  { %v3523_v41 = vadd.f32 %v2597_v50, %v1477_v51  ;;  %v1321_v61 = vpop.f32.mrf.mxu1 }
 0xae0   :  { %1496 = vrot.lane.b32.xlu0 %v3523_v41, %s2935_s25 }
 0xae5   :  { %v1480_v52 = vpop.f32.mrf.mxu0 }
 0xae6   :  { %v3527_v54 = vadd.f32 %v2597_v50, %v1480_v52  ;;  %v1324_v7 = vpop.f32.mrf.mxu1 }
 0xae8   :  { %1627 = vrot.lane.b32.xlu1 %v3527_v54, %s2936_s11  ;;  %1498 = vrot.lane.b32.xlu2 %v3527_v54, %s2935_s25  ;;  %v3582_v51 = vpack.i.bf16 %v3523_v41, %v3527_v54 }
 0xae9   :  { %1625 = vrot.lane.b32.xlu0 %v3523_v41, %s2936_s11 }
 0xaee   :  { %v1327_v9 = vpop.f32.mrf.mxu1 }
 0xaf0   :  { %1623 = vrot.lane.b32.xlu1 %v3527_v54, %s2937_s1  ;;  %1621 = vrot.lane.b32.xlu2 %v3523_v41, %s2937_s1 }
 0xb41   :  { %v1359_v57 = vpop.f32.mrf.mxu2 }
 0xb42   :  { %v1499_v59 = vpop.permute.xlu2 %1498  ;;  %v1360_v22 = vadd.f32 %v1359_v57, %v1318_v55 }
 0xb43   :  { %2449 = vmatpush.xpose.msk.msra.mxu1 %vm512_vm8, %v1499_v59 }
 0xb44   :  { %v1376_v49 = vadd.f32 %v2598_v15, %v1360_v22 }
 0xb46   :  { %v1380_v28 = vmax.f32 %v1376_v49, 0.0 }
 0xb49   :  { %v1362_v4 = vpop.f32.mrf.mxu2 }
 0xb4a   :  { %v1363_v16 = vadd.f32 %v1362_v4, %v1321_v61  ;;  %v1622_v36 = vpop.permute.xlu2 %1621 }
 0xb4c   :  { %v1377_v35 = vadd.f32 %v2598_v15, %v1363_v16 }
 0xb4e   :  { %v1381_v62 = vmax.f32 %v1377_v35, 0.0 }
 0xb51   :  { %v1365_v8 = vpop.f32.mrf.mxu2 }
 0xb52   :  { %v1497_v38 = vpop.permute.xlu0 %1496  ;;  %v1366_v11 = vadd.f32 %v1365_v8, %v1324_v7 }
 0xb53   :  { %2450 = vmatpush.xpose.msk.msra.mxu1 %vm512_vm8, %v1497_v38 }
 0xb54   :  { %v1378_v23 = vadd.f32 %v2598_v15, %v1366_v11 }
 0xb56   :  { %2451 = vmatmul.msk.f32.vlgmr.msra.gmra.mxu1 %vm512_vm8, %v3523_v41  ;;  %v1382_v6 = vmax.f32 %v1378_v23, 0.0 }
 0xb59   :  { %v1368_v12 = vpop.f32.mrf.mxu2 }
 0xb5a   :  { %v1369_v19 = vadd.f32 %v1368_v12, %v1327_v9  ;;  %v1628_v21 = vpop.permute.xlu1 %1627  ;;  %v1490_v12 = vld [vmem:[#allocation5 + $0x20] sm:$0xff] }
 0xb5b   :  { %2457 = vmatpush.xpose.msk.msrb.mxu0 %vm512_vm8, %v1628_v21  ;;  %v1626_v26 = vpop.permute.xlu0 %1625 }
 0xb5c   :  { %v1379_v24 = vadd.f32 %v2598_v15, %v1369_v19 }
 0xb5e   :  { %v1383_v25 = vmax.f32 %v1379_v24, 0.0  ;;  %2452 = vmatmul.msk.f32.gmra.mxu1 %vm512_vm8, %v3527_v54 }
 0xb5f   :  { %2458 = vmatpush.xpose.msk.msrb.mxu0 %vm512_vm8, %v1626_v26 }
 0xb60   :  { %1396 = vmatpush.msrb.mxu3 %v1383_v25 }
 0xb62   :  { %1397 = vmatpush.msrb.mxu3 %v1382_v6  ;;  %2459 = vmatmul.msk.f32.vlgmr.msrb.gmra.mxu0 %vm512_vm8, %v1622_v36  ;;  %v1624_v29 = vpop.permute.xlu1 %1623 }
 0xb64   :  { %1398 = vmatpush.msrb.mxu3 %v1381_v62 }
 0xb66   :  { %1399 = vmatpush.msrb.mxu3 %v1380_v28 }
 0xb67   :  { %2432 = vmatmul.msk.f32.vlgmr.msrb.gmra.mxu3 %vm336_vm5, %v3242_v1  ;;  %v2435_v1 = vld [vmem:[%s3790_s28 + $0x28] sm:$0xff]  ;;  %s2334_s28 = sshll.u32 %s3764_s23, 4  ;;  %s2335_s28 = int_to_ptr.hbm [resolvable:$true] %s2334_s28 }
 0xb68   :  { %1437 = vmatpush.msra.mxu3 %v2437_v31 }
 0xb6a   :  { %2460 = vmatmul.msk.f32.gmra.mxu0 %vm512_vm8, %v1624_v29  ;;  %1438 = vmatpush.msra.mxu3 %v2436_v32  ;;  %v1491_v29 = vld [vmem:[#allocation5 + $0x28] sm:$0xff] }
 0xb6c   :  { %1439 = vmatpush.msra.mxu3 %v2435_v1 }
 0xb6e   :  { %1440 = vmatpush.msra.mxu3 %v2434_v5 }
 0xb6f   :  { %2433 = vmatmul.msk.f32.gmra.mxu3 %vm336_vm5, %v3253_v3 }
 0xb70   :  { %1611 = vmatpush.msrb.mxu3 %v1490_v12 }
 0xbd3   :  { %v1525_v3 = vpop.f32.mrf.mxu1 }
 0xbd4   :  { %v1531_v33 = vmul.f32 0.35355338, %v1525_v3 }
 0xbd6   :  { %v1533_v34 = vsel %vm247_vm0, %v1531_v33, -inf }
 0xbd7   :  { %1534 = vmax.xlane.f32.xlu0 %v1533_v34 }
 0xbdb   :  { %v1528_v37 = vpop.f32.mrf.mxu1 }
 0xbdc   :  { %v1532_v39 = vmul.f32 0.35355338, %v1528_v37 }
 0xbde   :  { %v1536_v17 = vsel %vm247_vm0, %v1532_v39, -inf }
 0xbdf   :  { %1537 = vmax.xlane.f32.xlu1 %v1536_v17  ;;  %v1654_v40 = vpop.f32.mrf.mxu0 }
 0xbe0   :  { %v1660_v18 = vmul.f32 0.35355338, %v1654_v40 }
 0xbe2   :  { %v1662_v42 = vsel %vm247_vm0, %v1660_v18, -inf }
 0xbe3   :  { %1663 = vmax.xlane.f32.xlu2 %v1662_v42 }
 0xbe7   :  { %v1657_v43 = vpop.f32.mrf.mxu0 }
 0xbe8   :  { %v1661_v44 = vmul.f32 0.35355338, %v1657_v43 }
 0xbea   :  { %v1401_v45 = vpop.f32.mrf.mxu3  ;;  %v1665_v46 = vsel %vm247_vm0, %v1661_v44, -inf }
 0xbeb   :  { %v1407_v47 = vadd.f32 %v1401_v45, %v3451_v53  ;;  %1666 = vmax.xlane.f32.xlu0 %v1665_v46 }
 0xbed   :  { %2439 = vmatmul.msk.f32.vlgmr.msra.gmra.mxu3 %vm336_vm5, %v1407_v47 }
 0xbf2   :  { %v1404_v48 = vpop.f32.mrf.mxu3 }
 0xbf3   :  { %v1408_v50 = vadd.f32 %v1404_v48, %v3448_v27 }
 0xbf5   :  { %2440 = vmatmul.msk.f32.gmra.mxu3 %vm336_vm5, %v1408_v50 }
 0xbff   :  { %2567 = vrot.lane.b32.xlu0 %v3582_v51, %s2938_s16  ;;  %s3793_s16 = smov 8  }
 0xc07   :  { %1756 = vrot.lane.b32.xlu0 %v3527_v54, %s2939_s30 }
 0xc0f   :  { %1883 = vrot.lane.b32.xlu0 %v3523_v41, %s2940_s26 }
 0xc17   :  { %1754 = vrot.lane.b32.xlu0 %v3523_v41, %s2939_s30  ;;  %s3792_s30 = smov 48  }
 0xc1f   :  { %1752 = vrot.lane.b32.xlu0 %v3527_v54, %s2941_s17 }
 0xc4a   :  { %v1535_v52 = vpop.xlane.xlu0 %1534 }
 0xc4b   :  { %v1539_v55 = vsub.f32 %v1531_v33, %v1535_v52 }
 0xc4d   :  { %v1541_v57 = vmul.f32 1.442695, %v1539_v55 }
 0xc4f   :  { %2649 = vpow2.f32 %v1541_v57 }
 0xc52   :  { %v1538_v59 = vpop.xlane.xlu1 %1537 }
 0xc53   :  { %v1540_v61 = vsub.f32 %v1532_v39, %v1538_v59 }
 0xc55   :  { %v2650_v4 = vpop.eup %2649  ;;  %v1543_v7 = vmul.f32 1.442695, %v1540_v61 }
 0xc56   :  { %v1664_v8 = vpop.xlane.xlu2 %1663  ;;  %v1545_v38 = vsel %vm247_vm0, %v2650_v4, 0.0 }
 0xc57   :  { %2651 = vpow2.f32 %v1543_v7  ;;  %v1668_v9 = vsub.f32 %v1660_v18, %v1664_v8  ;;  %1546 = vadd.xlane.f32.xlu2 %v1545_v38 }
 0xc59   :  { %v1670_v11 = vmul.f32 1.442695, %v1668_v9  ;;  %v2600_v9 = vld [vmem:[%s3753_s12 + $0x1] ss:$0 sm:$0xff]  ;;  %s3791_s12 = smov 40  }
 0xc5b   :  { %2653 = vpow2.f32 %v1670_v11 }
 0xc5d   :  { %v2652_v15 = vpop.eup %2651 }
 0xc5e   :  { %v1667_v16 = vpop.xlane.xlu0 %1666  ;;  %v1548_v19 = vsel %vm247_vm0, %v2652_v15, 0.0 }
 0xc5f   :  { %v1669_v21 = vsub.f32 %v1661_v44, %v1667_v16  ;;  %1549 = vadd.xlane.f32.xlu2 %v1548_v19 }
 0xc61   :  { %v2654_v22 = vpop.eup %2653  ;;  %v1672_v23 = vmul.f32 1.442695, %v1669_v21 }
 0xc62   :  { %v1674_v24 = vsel %vm247_vm0, %v2654_v22, 0.0 }
 0xc63   :  { %2655 = vpow2.f32 %v1672_v23  ;;  %1675 = vadd.xlane.f32.xlu1 %v1674_v24 }
 0xc69   :  { %v2656_v35 = vpop.eup %2655 }
 0xc6a   :  { %v1677_v25 = vsel %vm247_vm0, %v2656_v35, 0.0 }
 0xc6b   :  { %1678 = vadd.xlane.f32.xlu2 %v1677_v25 }
 0xc70   :  { %v3624_v57 = vpop.f32.mrf.mxu3 }
 0xc71   :  { %v2568_v26 = vpop.permute.xlu0 %2567 }
 0xc72   :  { %v2569_v49 = vunpack.i.l.bf16 %v2568_v26  ;;  %v2570_v6 = vunpack.i.h.bf16 %v2568_v26 }
 0xc74   :  { %1581 = vmatpush.msrb.mxu2 %v2569_v49 }
 0xc76   :  { %1582 = vmatpush.msrb.mxu2 %v2570_v6 }
 0xc78   :  { %1740 = vmatpush.msra.mxu2 %v1491_v29  ;;  %v3626_v59 = vpop.f32.mrf.mxu3 }
 0xc79   :  { %v1757_v36 = vpop.permute.xlu0 %1756 }
 0xc7a   :  { %2465 = vmatpush.xpose.msk.msra.mxu3 %vm512_vm8, %v1757_v36 }
 0xc7c   :  { %2572 = vrot.lane.b32.xlu1 %v3582_v51, %s2942_s7 }
 0xc81   :  { %v1884_v62 = vpop.permute.xlu0 %1883 }
 0xc83   :  { %1885 = vrot.lane.b32.xlu2 %v3527_v54, %s2940_s26 }
 0xc84   :  { %1879 = vrot.lane.b32.xlu1 %v3523_v41, %s2943_s2 }
 0xc89   :  { %v1755_v28 = vpop.permute.xlu0 %1754 }
 0xc8a   :  { %2466 = vmatpush.xpose.msk.msra.mxu3 %vm512_vm8, %v1755_v28 }
 0xc8b   :  { %1881 = vrot.lane.b32.xlu2 %v3527_v54, %s2943_s2 }
 0xc8c   :  { %1750 = vrot.lane.b32.xlu1 %v3523_v41, %s2941_s17 }
 0xc91   :  { %v1753_v48 = vpop.permute.xlu0 %1752 }
 0xcca   :  { %v1547_v31 = vpop.xlane.xlu2 %1546 }
 0xccb   :  { %2657 = vrcp.f32 %v1547_v31 }
 0xcd1   :  { %v2658_v32 = vpop.eup %2657 }
 0xcd2   :  { %v1553_v1 = vmul.f32 %v2658_v32, %v2650_v4  ;;  %v1550_v5 = vpop.xlane.xlu2 %1549 }
 0xcd3   :  { %2659 = vrcp.f32 %v1550_v5 }
 0xcd4   :  { %2453 = vmatmul.msk.f32.vlgmr.msrb.gmra.mxu2 %vm247_vm0, %v1553_v1 }
 0xcd6   :  { %v1676_v37 = vpop.xlane.xlu1 %1675 }
 0xcd7   :  { %2661 = vrcp.f32 %v1676_v37 }
 0xcd9   :  { %v2660_v3 = vpop.eup %2659 }
 0xcda   :  { %v1554_v33 = vmul.f32 %v2660_v3, %v2652_v15 }
 0xcdc   :  { %2454 = vmatmul.msk.f32.gmra.mxu2 %vm247_vm0, %v1554_v33 }
 0xcdd   :  { %v2662_v39 = vpop.eup %2661 }
 0xcde   :  { %v1679_v34 = vpop.xlane.xlu2 %1678  ;;  %v1682_v18 = vmul.f32 %v2662_v39, %v2654_v22 }
 0xcdf   :  { %2663 = vrcp.f32 %v1679_v34 }
 0xce5   :  { %v2664_v42 = vpop.eup %2663 }
 0xce6   :  { %v1886_v54 = vpop.permute.xlu2 %1885  ;;  %v1683_v43 = vmul.f32 %v2664_v42, %v2656_v35 }
 0xce7   :  { %2473 = vmatpush.xpose.msk.msrb.mxu2 %vm512_vm8, %v1886_v54 }
 0xceb   :  { %2474 = vmatpush.xpose.msk.msrb.mxu2 %vm512_vm8, %v1884_v62 }
 0xcee   :  { %v2573_v41 = vpop.permute.xlu1 %2572  ;;  %v1882_v55 = vpop.permute.xlu2 %1881 }
 0xcef   :  { %v2574_v17 = vunpack.i.l.bf16 %v2573_v41  ;;  %v2575_v40 = vunpack.i.h.bf16 %v2573_v41 }
 0xcf1   :  { %1710 = vmatpush.msrb.mxu1 %v2574_v17 }
 0xcf3   :  { %1711 = vmatpush.msrb.mxu1 %v2575_v40 }
 0xcf4   :  { %2461 = vmatmul.msk.f32.vlgmr.msrb.gmra.mxu1 %vm247_vm0, %v1682_v18 }
 0xcf6   :  { %v1880_v45 = vpop.permute.xlu1 %1879 }
 0xcfc   :  { %2462 = vmatmul.msk.f32.gmra.mxu1 %vm247_vm0, %v1683_v43 }
 0xcfe   :  { %v1751_v47 = vpop.permute.xlu1 %1750 }
 0xd57   :  { %v1584_v44 = vpop.f32.mrf.mxu2 }
 0xd58   :  { %2455 = vmatmul.msk.f32.vlgmr.msrb.gmra.mxu3 %vm512_vm8, %v1584_v44 }
 0xd5f   :  { %v1587_v46 = vpop.f32.mrf.mxu2 }
 0xd60   :  { %2456 = vmatmul.msk.f32.gmra.mxu3 %vm512_vm8, %v1587_v46 }
 0xd68   :  { %2467 = vmatmul.msk.f32.vlgmr.msra.gmra.mxu3 %vm512_vm8, %v1751_v47 }
 0xd70   :  { %2468 = vmatmul.msk.f32.gmra.mxu3 %vm512_vm8, %v1753_v48 }
 0xd71   :  { %v1713_v50 = vpop.f32.mrf.mxu1 }
 0xd72   :  { %2463 = vmatmul.msk.f32.vlgmr.msra.gmra.mxu2 %vm512_vm8, %v1713_v50 }
 0xd79   :  { %v1716_v52 = vpop.f32.mrf.mxu1 }
 0xd7a   :  { %2464 = vmatmul.msk.f32.gmra.mxu2 %vm512_vm8, %v1716_v52 }
 0xd82   :  { %2475 = vmatmul.msk.f32.vlgmr.msrb.gmra.mxu2 %vm512_vm8, %v1880_v45 }
 0xd8a   :  { %2476 = vmatmul.msk.f32.gmra.mxu2 %vm512_vm8, %v1882_v55 }
 0xddb   :  { %v1613_v61 = vpop.f32.mrf.mxu3 }
 0xddc   :  { %v1619_v11 = vadd.f32 %v2600_v9, %v1613_v61 }
 0xde3   :  { %v1616_v4 = vpop.f32.mrf.mxu3 }
 0xde4   :  { %v1620_v16 = vadd.f32 %v2600_v9, %v1616_v4 }
 0xdeb   :  { %v1783_v7 = vpop.f32.mrf.mxu3 }
 0xdec   :  { %v1789_v8 = vmul.f32 0.35355338, %v1783_v7 }
 0xdee   :  { %v1791_v38 = vsel %vm247_vm0, %v1789_v8, -inf }
 0xdef   :  { %1792 = vmax.xlane.f32.xlu2 %v1791_v38 }
 0xdf3   :  { %v1786_v35 = vpop.f32.mrf.mxu3 }
 0xdf4   :  { %v1790_v25 = vmul.f32 0.35355338, %v1786_v35 }
 0xdf5   :  { %v1742_v12 = vpop.f32.mrf.mxu2 }
 0xdf6   :  { %v3632_v15 = vadd.f32 %v1742_v12, %v1619_v11  ;;  %v1794_v36 = vsel %vm247_vm0, %v1790_v25, -inf  ;;  %v1492_v11 = vld [vmem:[#allocation5 + $0x30] sm:$0xff]  ;;  %v1493_v12 = vld [vmem:[#allocation5 + $0x38] sm:$0xff] }
 0xdf7   :  { %1869 = vmatpush.msra.mxu1 %v1492_v11 }
 0xdfd   :  { %v1745_v19 = vpop.f32.mrf.mxu2 }
 0xdfe   :  { %v3634_v21 = vadd.f32 %v1745_v19, %v1620_v16 }
 0xe05   :  { %v1912_v22 = vpop.f32.mrf.mxu2 }
 0xe06   :  { %v1918_v23 = vmul.f32 0.35355338, %v1912_v22 }
 0xe08   :  { %v1920_v24 = vsel %vm247_vm0, %v1918_v23, -inf }
 0xe09   :  { %1921 = vmax.xlane.f32.xlu1 %v1920_v24  ;;  %v2599_v24 = vld [vmem:[%s3749_s8 + $0x1] ss:$0 sm:$0xff] }
 0xe0a   :  { %v1443_v35 = vadd.f32 %v2599_v24, %v3624_v57 }
 0xe0d   :  { %v1915_v26 = vpop.f32.mrf.mxu2 }
 0xe0e   :  { %v1919_v49 = vmul.f32 0.35355338, %v1915_v26  ;;  %v1448_v26 = vmax.f32 %v1443_v35, 0.0 }
 0xe10   :  { %v1923_v6 = vsel %vm247_vm0, %v1919_v49, -inf }
 0xe11   :  { %1924 = vmax.xlane.f32.xlu0 %v1923_v6  ;;  %1795 = vmax.xlane.f32.xlu1 %v1794_v36  ;;  %v2008_v36 = vadd.f32 %v1448_v26, %v3451_v53 }
 0xe2a   :  { %2577 = vrot.lane.b32.xlu1 %v3582_v51, %s3791_s12  ;;  %s3794_s12 = smov 128  }
 0xe62   :  { %v1793_v62 = vpop.xlane.xlu2 %1792 }
 0xe63   :  { %v1797_v28 = vsub.f32 %v1789_v8, %v1793_v62 }
 0xe65   :  { %v1799_v29 = vmul.f32 1.442695, %v1797_v28 }
 0xe67   :  { %2665 = vpow2.f32 %v1799_v29  ;;  %v1446_v29 = vadd.f32 %v2599_v24, %v3626_v59 }
 0xe6d   :  { %v2666_v31 = vpop.eup %2665 }
 0xe6e   :  { %v1803_v32 = vsel %vm247_vm0, %v2666_v31, 0.0 }
 0xe6f   :  { %1804 = vadd.xlane.f32.xlu0 %v1803_v32  ;;  %v1449_v32 = vmax.f32 %v1446_v29, 0.0  ;;  %v2486_v29 = vld [vmem:[%s3756_s15 + $0x50] sm:$0xff] }
 0xe71   :  { %v2009_v57 = vadd.f32 %v1449_v32, %v3448_v27  ;;  %v2484_v32 = vld [vmem:[%s3756_s15 + $0x40] sm:$0xff] }
 0xe7c   :  { %v1922_v1 = vpop.xlane.xlu1 %1921 }
 0xe7d   :  { %v1926_v5 = vsub.f32 %v1918_v23, %v1922_v1 }
 0xe7f   :  { %v1928_v3 = vmul.f32 1.442695, %v1926_v5 }
 0xe81   :  { %2667 = vpow2.f32 %v1928_v3 }
 0xe83   :  { %2582 = vrot.lane.b32.xlu0 %v3582_v51, %s3792_s30 }
 0xe84   :  { %v1925_v33 = vpop.xlane.xlu0 %1924  ;;  %v1796_v34 = vpop.xlane.xlu1 %1795 }
 0xe85   :  { %v1927_v37 = vsub.f32 %v1919_v49, %v1925_v33  ;;  %v1798_v39 = vsub.f32 %v1790_v25, %v1796_v34 }
 0xe87   :  { %v2668_v54 = vpop.eup %2667  ;;  %v1930_v41 = vmul.f32 1.442695, %v1927_v37  ;;  %v1801_v40 = vmul.f32 1.442695, %v1798_v39 }
 0xe88   :  { %v1932_v17 = vsel %vm247_vm0, %v2668_v54, 0.0 }
 0xe89   :  { %2669 = vpow2.f32 %v1930_v41  ;;  %1933 = vadd.xlane.f32.xlu2 %v1932_v17 }
 0xe8a   :  { %2671 = vpow2.f32 %v1801_v40 }
 0xe8f   :  { %v2670_v18 = vpop.eup %2669 }
 0xe90   :  { %v1935_v42 = vsel %vm247_vm0, %v2670_v18, 0.0  ;;  %v2672_v43 = vpop.eup %2671 }
 0xe91   :  { %1936 = vadd.xlane.f32.xlu2 %v1935_v42  ;;  %v1806_v44 = vsel %vm247_vm0, %v2672_v43, 0.0  ;;  %v2073_v42 = vld [vmem:[#allocation7 + $0x30] sm:$0xff] }
 0xe99   :  { %1807 = vadd.xlane.f32.xlu2 %v1806_v44  ;;  %v2071_v44 = vld [vmem:[#allocation7 + $0x20] sm:$0xff] }
 0xe9c   :  { %v2578_v51 = vpop.permute.xlu1 %2577 }
 0xe9d   :  { %v2579_v45 = vunpack.i.l.bf16 %v2578_v51  ;;  %v2580_v46 = vunpack.i.h.bf16 %v2578_v51 }
 0xe9f   :  { %1968 = vmatpush.msrb.mxu3 %v2579_v45 }
 0xea1   :  { %1969 = vmatpush.msrb.mxu3 %v2580_v46 }
 0xea3   :  { %2232 = vmatpush.msra.mxu3 %v3425_v58 }
 0xea5   :  { %2233 = vmatpush.msra.mxu3 %v3431_v60 }
 0xea7   :  { %2234 = vmatpush.msra.mxu3 %v3438_v63 }
 0xea9   :  { %2235 = vmatpush.msra.mxu3 %v3443_v0 }
 0xee2   :  { %v1805_v47 = vpop.xlane.xlu0 %1804 }
 0xee3   :  { %2673 = vrcp.f32 %v1805_v47  ;;  %v2491_v47 = vld [vmem:[%s3756_s15 + $0x78] sm:$0xff] }
 0xee4   :  { %2139 = vmatpush.msra.mxu2 %v2491_v47 }
 0xee9   :  { %v2674_v50 = vpop.eup %2673 }
 0xeea   :  { %v1811_v61 = vmul.f32 %v2674_v50, %v2666_v31 }
 0xef5   :  { %v2583_v48 = vpop.permute.xlu0 %2582 }
 0xef6   :  { %v2584_v52 = vunpack.i.l.bf16 %v2583_v48  ;;  %v2585_v55 = vunpack.i.h.bf16 %v2583_v48  ;;  %v2490_v48 = vld [vmem:[%s3756_s15 + $0x70] sm:$0xff] }
 0xef7   :  { %2140 = vmatpush.msra.mxu2 %v2490_v48 }
 0xef8   :  { %1839 = vmatpush.msra.mxu0 %v2584_v52  ;;  %v2489_v52 = vld [vmem:[%s3756_s15 + $0x68] sm:$0xff] }
 0xef9   :  { %2141 = vmatpush.msra.mxu2 %v2489_v52 }
 0xefa   :  { %1840 = vmatpush.msra.mxu0 %v2585_v55 }
 0xefb   :  { %2469 = vmatmul.msk.f32.vlgmr.msra.gmra.mxu0 %vm247_vm0, %v1811_v61 }
 0xefc   :  { %v1934_v4 = vpop.xlane.xlu2 %1933  ;;  %1998 = vmatpush.msrb.mxu0 %v1493_v12 }
 0xefd   :  { %2675 = vrcp.f32 %v1934_v4 }
 0xf03   :  { %v2676_v58 = vpop.eup %2675 }
 0xf04   :  { %v1940_v7 = vmul.f32 %v2676_v58, %v2668_v54  ;;  %v1937_v60 = vpop.xlane.xlu2 %1936  ;;  %v2488_v58 = vld [vmem:[%s3756_s15 + $0x60] sm:$0xff] }
 0xf05   :  { %2677 = vrcp.f32 %v1937_v60  ;;  %2142 = vmatpush.msra.mxu2 %v2488_v58  ;;  %v2253_v58 = vadd.s32 4, %v3245_v2 }
 0xf06   :  { %2477 = vmatmul.msk.f32.vlgmr.msrb.gmra.mxu3 %vm247_vm0, %v1940_v7 }
 0xf0b   :  { %v2678_v63 = vpop.eup %2677 }
 0xf0c   :  { %v1808_v0 = vpop.xlane.xlu2 %1807  ;;  %v1941_v8 = vmul.f32 %v2678_v63, %v2670_v18  ;;  %v2074_v18 = vld [vmem:[#allocation7 + $0x38] sm:$0xff]  ;;  %v2487_v63 = vld [vmem:[%s3756_s15 + $0x58] sm:$0xff] }
 0xf0d   :  { %2679 = vrcp.f32 %v1808_v0  ;;  %2098 = vmatpush.msrb.mxu1 %v2074_v18  ;;  %2143 = vmatpush.msra.mxu2 %v2487_v63 }
 0xf0e   :  { %2478 = vmatmul.msk.f32.gmra.mxu3 %vm247_vm0, %v1941_v8 }
 0xf0f   :  { %2099 = vmatpush.msrb.mxu1 %v2073_v42  ;;  %2144 = vmatpush.msra.mxu2 %v2486_v29 }
 0xf13   :  { %v2680_v38 = vpop.eup %2679 }
 0xf14   :  { %v1812_v9 = vmul.f32 %v2680_v38, %v2672_v43  ;;  %v2072_v43 = vld [vmem:[#allocation7 + $0x28] sm:$0xff] }
 0xf15   :  { %2100 = vmatpush.msrb.mxu1 %v2072_v43 }
 0xf16   :  { %2470 = vmatmul.msk.f32.gmra.mxu0 %vm247_vm0, %v1812_v9  ;;  %v2601_v9 = vld [vmem:[#allocation10 + $0x1] ss:$0 sm:$0xff] }
 0xf17   :  { %2101 = vmatpush.msrb.mxu1 %v2071_v44 }
 0xf78   :  { %v1842_v16 = vpop.f32.mrf.mxu0 }
 0xf79   :  { %2471 = vmatmul.msk.f32.vlgmr.msra.gmra.mxu1 %vm512_vm8, %v1842_v16 }
 0xf89   :  { %v1971_v19 = vpop.f32.mrf.mxu3 }
 0xf8a   :  { %2479 = vmatmul.msk.f32.vlgmr.msrb.gmra.mxu0 %vm512_vm8, %v1971_v19  ;;  %v2602_v19 = vld [vmem:[#allocation11 + $0x1] ss:$0 sm:$0xff] }
 0xf91   :  { %v1974_v22 = vpop.f32.mrf.mxu3 }
 0xf92   :  { %2480 = vmatmul.msk.f32.gmra.mxu0 %vm512_vm8, %v1974_v22 }
 0xf93   :  { %v1845_v23 = vpop.f32.mrf.mxu0 }
 0xf94   :  { %2472 = vmatmul.msk.f32.gmra.mxu1 %vm512_vm8, %v1845_v23 }
 0xff6   :  { %v1871_v25 = vpop.f32.mrf.mxu1 }
 0xff7   :  { %v1877_v49 = vadd.f32 %v1871_v25, %v3632_v15 }
0x1007   :  { %v2000_v6 = vpop.f32.mrf.mxu0 }
0x1008   :  { %v2006_v62 = vadd.f32 %v2000_v6, %v1877_v49 }
0x100a   :  { %v2010_v28 = vadd.f32 %v2008_v36, %v2006_v62 }
0x100c   :  { %v2016_v31 = vsel %vm336_vm5, %v2010_v28, 0.0 }
0x100d   :  { %2017 = vadd.xlane.f32.xlu2 %v2016_v31  ;;  %v2485_v31 = vld [vmem:[%s3756_s15 + $0x48] sm:$0xff] }
0x100e   :  { %2145 = vmatpush.msra.mxu2 %v2485_v31 }
0x100f   :  { %v2003_v3 = vpop.f32.mrf.mxu0 }
0x1010   :  { %2146 = vmatpush.msra.mxu2 %v2484_v32 }
0x1011   :  { %v1874_v1 = vpop.f32.mrf.mxu1 }
0x1012   :  { %v1878_v5 = vadd.f32 %v1874_v1, %v3634_v21  ;;  %v2603_v1 = vld [vmem:[%s3755_s14 + $0x1] ss:$0 sm:$0xff] }
0x1014   :  { %v2007_v33 = vadd.f32 %v2003_v3, %v1878_v5 }
0x1016   :  { %v2011_v34 = vadd.f32 %v2009_v57, %v2007_v33 }
0x1018   :  { %v2019_v15 = vsel %vm336_vm5, %v2011_v34, 0.0 }
0x1019   :  { %2020 = vadd.xlane.f32.xlu1 %v2019_v15 }
0x1080   :  { %v2018_v53 = vpop.xlane.xlu2 %2017 }
0x1081   :  { %v2022_v37 = vmul.f32 %v2018_v53, %v3377_v30  ;;  %v2604_v53 = vld [vmem:[#allocation8 + $0x1] ss:$0 sm:$0xff] }
0x1083   :  { %v2024_v54 = vsub.f32 %v2010_v28, %v2022_v37 }
0x1085   :  { %v2026_v59 = vmul.f32 %v2024_v54, %v2024_v54 }
0x1087   :  { %v2028_v41 = vsel %vm336_vm5, %v2026_v59, 0.0 }
0x1088   :  { %2029 = vadd.xlane.f32.xlu2 %v2028_v41 }
0x108c   :  { %v2021_v39 = vpop.xlane.xlu1 %2020 }
0x108d   :  { %v2023_v17 = vmul.f32 %v2021_v39, %v3377_v30 }
0x108f   :  { %v2025_v21 = vsub.f32 %v2011_v34, %v2023_v17 }
0x1091   :  { %v2027_v40 = vmul.f32 %v2025_v21, %v2025_v21 }
0x1093   :  { %v2031_v27 = vsel %vm336_vm5, %v2027_v40, 0.0 }
0x1094   :  { %2032 = vadd.xlane.f32.xlu0 %v2031_v27 }
0x10fb   :  { %v2030_v51 = vpop.xlane.xlu2 %2029 }
0x10fc   :  { %v2034_v45 = vmul.f32 %v2030_v51, %v3377_v30 }
0x10fe   :  { %v2036_v46 = vadd.f32 1e-05, %v2034_v45 }
0x1100   :  { %2681 = vrsqrt.f32 %v2036_v46  ;;  %vm2044_vm8 = vweird.f32 %v2036_v46 }
0x1106   :  { %v2682_v50 = vpop.eup %2681 }
0x1107   :  { %v2039_v55 = vmul.f32 %v2682_v50, %v2036_v46  ;;  %v2033_v61 = vpop.xlane.xlu0 %2032  ;;  %vm2045_vm0 = vweird.f32 %v2682_v50 }
0x1108   :  { %v2035_v4 = vmul.f32 %v2033_v61, %v3377_v30  ;;  %vm2046_vm10 = vmor %vm2044_vm8, %vm2045_vm0  ;;  %vm2247_vm8 = vcmp.eq.s32.totalorder %v3232_v56, %v3142_v10 }
0x1109   :  { %v2040_v7 = vmul.f32 %v2682_v50, %v2039_v55  ;;  %v2250_v55 = vadd.s32 16, %v3232_v56 }
0x110a   :  { %v2037_v60 = vadd.f32 1e-05, %v2035_v4  ;;  %v2947_v4 = vmov 1.0  }
0x110b   :  { %v2041_v0 = vmul.f32 0.5, %v2040_v7  ;;  %v2254_v61 = vadd.s32 4, %v2250_v55  ;;  %v2252_v7 = vadd.s32 4, %v3232_v56 }
0x110c   :  { %2683 = vrsqrt.f32 %v2037_v60  ;;  %vm2054_vm12 = vweird.f32 %v2037_v60 }
0x110d   :  { %v2042_v8 = vsub.f32 1.5, %v2041_v0  ;;  %vm2258_vm15 = vcmp.eq.s32.totalorder %v2254_v61, %v3142_v10  ;;  %vm2256_vm2 = vcmp.eq.s32.totalorder %v2252_v7, %v3142_v10 }
0x110f   :  { %v2043_v38 = vmul.f32 %v2682_v50, %v2042_v8 }
0x1111   :  { %v2047_v11 = vsel %vm2046_vm10, %v2682_v50, %v2043_v38  ;;  %v2251_v50 = vadd.s32 24, %v3232_v56  ;;  %vm2298_vm10 = vcmask 1043456  }
0x1112   :  { %v2684_v12 = vpop.eup %2683  ;;  %v2058_v16 = vmul.f32 %v2047_v11, %v2024_v54 }
0x1113   :  { %v2049_v22 = vmul.f32 %v2684_v12, %v2037_v60  ;;  %vm2055_vm11 = vweird.f32 %v2684_v12  ;;  %v2255_v52 = vadd.s32 4, %v2251_v50 }
0x1114   :  { %v2063_v23 = vmul.f32 %v2601_v9, %v2058_v16  ;;  %vm2056_vm13 = vmor %vm2054_vm12, %vm2055_vm11  ;;  %vm2291_vm11 = vcmask 31744  }
0x1115   :  { %v2050_v24 = vmul.f32 %v2684_v12, %v2049_v22  ;;  %vm2259_vm14 = vcmp.eq.s32.totalorder %v2255_v52, %v3142_v10 }
0x1116   :  { %v2068_v35 = vadd.f32 %v2602_v19, %v2063_v23  ;;  %2501 = vmatpush.msk.msra.mxu0 %vm2259_vm14, %v2947_v4  ;;  %v2605_v23 = vld [vmem:[#allocation13 + $0x1] ss:$0 sm:$0xff] }
0x1117   :  { %v2051_v25 = vmul.f32 0.5, %v2050_v24 }
0x1118   :  { %2482 = vmatmul.msk.f32.vlgmr.msrb.gmra.mxu1 %vm336_vm5, %v2068_v35  ;;  %2502 = vmatpush.msk.msra.mxu0 %vm2258_vm15, %v2947_v4 }
0x1119   :  { %v2052_v26 = vsub.f32 1.5, %v2051_v25 }
0x111b   :  { %v2053_v49 = vmul.f32 %v2684_v12, %v2052_v26  ;;  %v2606_v26 = vld [vmem:[#allocation14 + $0x1] ss:$0 sm:$0xff] }
0x111d   :  { %v2057_v6 = vsel %vm2056_vm13, %v2684_v12, %v2053_v49 }
0x111e   :  { %v2059_v36 = vmul.f32 %v2057_v6, %v2025_v21 }
0x1120   :  { %v2064_v62 = vmul.f32 %v2601_v9, %v2059_v36 }
0x1122   :  { %v2069_v28 = vadd.f32 %v2602_v19, %v2064_v62 }
0x1124   :  { %2483 = vmatmul.msk.f32.gmra.mxu1 %vm336_vm5, %v2069_v28 }
0x1195   :  { %v2103_v5 = vpop.f32.mrf.mxu1 }
0x1196   :  { %v2104_v3 = vadd.f32 %v2603_v1, %v2103_v5 }
0x1198   :  { %v2109_v57 = vmax.f32 %v2104_v3, 0.0  ;;  %v2496_v3 = vsel %vm2247_vm8, 1.0, %v2934_v13 }
0x1199   :  { %2507 = vmatpush.msk.msra.mxu1 %vm2298_vm10, %v2496_v3 }
0x119a   :  { %2492 = vmatmul.msk.f32.vlgmr.msra.gmra.mxu2 %vm1139_vm1, %v2109_v57  ;;  %v2596_v57 = vld [vmem:[%s3763_s22] ss:$0 sm:$0xff]  ;;  %s2332_s22 = sshll.u32 %s2948_s21, 4  ;;  %s2333_s22 = int_to_ptr.vmem [resolvable:$true] %s2332_s22 }
0x11a1   :  { %v2106_v33 = vpop.f32.mrf.mxu1 }
0x11a2   :  { %v2107_v34 = vadd.f32 %v2603_v1, %v2106_v33  ;;  %v1259_v33 = vadd.f32 %v2596_v57, %v3569_v14 }
0x11a4   :  { %v2110_v15 = vmax.f32 %v2107_v34, 0.0 }
0x11a6   :  { %2493 = vmatmul.msk.f32.gmra.mxu2 %vm1139_vm1, %v2110_v15  ;;  %vm2257_vm1 = vcmp.eq.s32.totalorder %v2253_v58, %v3142_v10 }
0x11a7   :  { %2503 = vmatpush.msk.msra.mxu0 %vm2257_vm1, %v2947_v4 }
0x11a9   :  { %2504 = vmatpush.msk.msra.mxu0 %vm2256_vm2, %v2947_v4 }
0x121d   :  { %v2148_v37 = vpop.f32.mrf.mxu2 }
0x121e   :  { %v2149_v54 = vadd.f32 %v2604_v53, %v2148_v37  ;;  %v1262_v37 = vadd.f32 %v2596_v57, %v3572_v20 }
0x1220   :  { %v2154_v59 = vadd.f32 %v2149_v54, %v2068_v35 }
0x1222   :  { %v2160_v41 = vsel %vm336_vm5, %v2154_v59, 0.0 }
0x1223   :  { %2161 = vadd.xlane.f32.xlu2 %v2160_v41 }
0x1229   :  { %v2151_v39 = vpop.f32.mrf.mxu2 }
0x122a   :  { %v2152_v17 = vadd.f32 %v2604_v53, %v2151_v39 }
0x122c   :  { %v2155_v21 = vadd.f32 %v2152_v17, %v2069_v28 }
0x122e   :  { %v2163_v40 = vsel %vm336_vm5, %v2155_v21, 0.0 }
0x122f   :  { %2164 = vadd.xlane.f32.xlu2 %v2163_v40 }
0x1296   :  { %v2162_v27 = vpop.xlane.xlu2 %2161 }
0x1297   :  { %v2166_v18 = vmul.f32 %v2162_v27, %v3377_v30 }
0x1299   :  { %v2168_v42 = vsub.f32 %v2154_v59, %v2166_v18 }
0x129b   :  { %v2170_v43 = vmul.f32 %v2168_v42, %v2168_v42 }
0x129d   :  { %v2172_v44 = vsel %vm336_vm5, %v2170_v43, 0.0 }
0x129e   :  { %2173 = vadd.xlane.f32.xlu2 %v2172_v44 }
0x12a2   :  { %v2165_v51 = vpop.xlane.xlu2 %2164 }
0x12a3   :  { %v2167_v45 = vmul.f32 %v2165_v51, %v3377_v30 }
0x12a5   :  { %v2169_v46 = vsub.f32 %v2155_v21, %v2167_v45 }
0x12a7   :  { %v2171_v47 = vmul.f32 %v2169_v46, %v2169_v46 }
0x12a9   :  { %v2175_v48 = vsel %vm336_vm5, %v2171_v47, 0.0 }
0x12aa   :  { %2176 = vadd.xlane.f32.xlu2 %v2175_v48 }
0x1311   :  { %v2174_v60 = vpop.xlane.xlu2 %2173 }
0x1312   :  { %v2178_v63 = vmul.f32 %v2174_v60, %v3377_v30 }
0x1314   :  { %v2180_v0 = vadd.f32 1e-05, %v2178_v63 }
0x1316   :  { %2685 = vrsqrt.f32 %v2180_v0  ;;  %vm2188_vm4 = vweird.f32 %v2180_v0 }
0x131c   :  { %v2686_v8 = vpop.eup %2685 }
0x131d   :  { %v2183_v38 = vmul.f32 %v2686_v8, %v2180_v0  ;;  %v2177_v9 = vpop.xlane.xlu2 %2176  ;;  %vm2189_vm3 = vweird.f32 %v2686_v8 }
0x131e   :  { %v2179_v11 = vmul.f32 %v2177_v9, %v3377_v30  ;;  %vm2190_vm6 = vmor %vm2188_vm4, %vm2189_vm3 }
0x131f   :  { %v2184_v2 = vmul.f32 %v2686_v8, %v2183_v38 }
0x1320   :  { %v2181_v12 = vadd.f32 1e-05, %v2179_v11 }
0x1321   :  { %v2185_v16 = vmul.f32 0.5, %v2184_v2 }
0x1322   :  { %2687 = vrsqrt.f32 %v2181_v12  ;;  %vm2198_vm9 = vweird.f32 %v2181_v12 }
0x1323   :  { %v2186_v19 = vsub.f32 1.5, %v2185_v16 }
0x1325   :  { %v2187_v22 = vmul.f32 %v2686_v8, %v2186_v19 }
0x1327   :  { %v2191_v24 = vsel %vm2190_vm6, %v2686_v8, %v2187_v22 }
0x1328   :  { %v2688_v35 = vpop.eup %2687  ;;  %v2202_v25 = vmul.f32 %v2191_v24, %v2168_v42 }
0x1329   :  { %v2193_v49 = vmul.f32 %v2688_v35, %v2181_v12  ;;  %vm2199_vm7 = vweird.f32 %v2688_v35 }
0x132a   :  { %v2207_v6 = vmul.f32 %v2605_v23, %v2202_v25  ;;  %vm2200_vm0 = vmor %vm2198_vm9, %vm2199_vm7 }
0x132b   :  { %v2194_v36 = vmul.f32 %v2688_v35, %v2193_v49 }
0x132c   :  { %v2212_v62 = vadd.f32 %v2606_v26, %v2207_v6 }
0x132d   :  { %v2195_v28 = vmul.f32 0.5, %v2194_v36 }
0x132e   :  { %2494 = vmatmul.msk.f32.vlgmr.msra.gmra.mxu3 %vm336_vm5, %v2212_v62  ;;  %2505 = vmatmul.msk.f32.vlgmr.msra.gmra.mxu0 %vm336_vm5, %v2212_v62 }
0x132f   :  { %v2196_v30 = vsub.f32 1.5, %v2195_v28 }
0x1331   :  { %v2197_v29 = vmul.f32 %v2688_v35, %v2196_v30 }
0x1333   :  { %v2201_v31 = vsel %vm2200_vm0, %v2688_v35, %v2197_v29 }
0x1334   :  { %v2203_v32 = vmul.f32 %v2201_v31, %v2169_v46 }
0x1336   :  { %v2208_v1 = vmul.f32 %v2605_v23, %v2203_v32 }
0x1338   :  { %v2213_v5 = vadd.f32 %v2606_v26, %v2208_v1 }
0x133a   :  { %2495 = vmatmul.msk.f32.gmra.mxu3 %vm336_vm5, %v2213_v5  ;;  %2506 = vmatmul.msk.f32.gmra.mxu0 %vm336_vm5, %v2213_v5  ;;  %vm2325_vm5 = vcmask 293888  }
0x13ab   :  { %v2285_v56 = vpop.f32.mrf.mxu0 }
0x13b1   :  { %v2237_v34 = vpop.f32.mrf.mxu3 }
0x13b2   :  { %v2243_v15 = vadd.f32 %v2237_v34, %v1259_v33 }
0x13b4   :  { %v2245_v53 = vadd.f32 %v2596_v57, %v2243_v15 }
0x13b6   :  { %2508 = vmatmul.msk.f32.vlgmr.msra.gmra.mxu1 %vm2291_vm11, %v2245_v53 }
0x13b7   :  { %v2288_v14 = vpop.f32.mrf.mxu0 }
0x13bd   :  { %v2240_v54 = vpop.f32.mrf.mxu3 }
0x13be   :  { %v2244_v59 = vadd.f32 %v2240_v54, %v1262_v37 }
0x13c0   :  { %v2246_v10 = vadd.f32 %v2596_v57, %v2244_v59 }
0x13c2   :  { %2509 = vmatmul.msk.f32.gmra.mxu1 %vm2291_vm11, %v2246_v10 }
0x1433   :  { %v2319_v13 = vpop.f32.mrf.mxu1 }
0x1434   :  { %v2320_v41 = vadd.f32 %v2319_v13, %v2285_v56 }
0x1436   :  { %2326 = vst.msk [vmem:[#allocation16] sm:$0xff] %vm2325_vm5, %v2320_v41 }
0x143f   :  { %v2322_v39 = vpop.f32.mrf.mxu1 }
0x1440   :  { %v2323_v17 = vadd.f32 %v2322_v39, %v2288_v14 }
0x1442   :  { %2327 = vst.msk [vmem:[#allocation16 + $0x8] sm:$0xff] %vm2325_vm5, %v2323_v17 }
0x1443   :  { %2340 = dma.vmem_to_hbm [thread:$0]  %s2333_s22, 256, %s2335_s28, [#allocation4], %s3794_s12, %s3794_s12, %s3793_s16  }
0x1444   :  { %2919 = dma.done.wait [#allocation4], 256  }
0x1445   :  { %2920 = vsyncadd [#allocation4], 4294967040 }
0x1446   :  { %2345 = vsyncpa [#allocation3], 1 }
0x1447   :  { %2346 = vsyncpa [#allocation6], 1 }
0x1448   :  { %2347 = vsyncpa [#allocation9], 1 }
0x1449   :  { %2348 = vsyncpa [#allocation12], 1 }
0x144a   :  { %2349 = vsyncpa [#allocation15], 1 }
0x144b   :  { %2350 = vsyncpa [#allocation4], 1 }

</bundles_post_ra>
